<compile_context>
chip_gen: v5e
topology: v5e:2x2
jax: 0.10.0
libtpu: 0.0.40
codegen_flags: <defaults>
</compile_context>

<pallas_src>
import jax
import jax.numpy as jnp
import numpy as np
from jax.experimental import pallas as pl
from jax.experimental.pallas import tpu as pltpu

# Make both the in-kernel MXU dots and the pure-JAX reference use true f32
# matmul accumulation (faithful to the f32 PyTorch module, and keeps the
# kernel-vs-reference spike patterns bit-consistent at threshold compares).
jax.config.update("jax_default_matmul_precision", "highest")


def _soma_net_kernel(x_ref, n1_ref, n2_ref,
                     w1_ref, b1_ref, p1_ref,
                     w2_ref, b2_ref, p2_ref,
                     w3_ref, b3_ref,
                     out_ref,
                     s1_buf, s2_buf):
    TB, I = x_ref.shape                     # TB = T*B, time-major rows (t*B + b)
    H1 = w1_ref.shape[1]
    H2 = w2_ref.shape[1]
    B, O = out_ref.shape
    T = TB // B
    f32 = jnp.float32

    # ---- per-layer constants, kept (1, H) and broadcast implicitly.
    # params rows: 0=tau_m, 1=v_th, 2=v_reset, 3=adaptation_mask, 4=adaptation_strength
    def lif_consts(p_ref):
        decay = 1.0 - 1.0 / p_ref[0:1, :]
        vth0 = p_ref[1:2, :]
        v_reset = p_ref[2:3, :]
        mask = p_ref[3:4, :] > 0.0
        strength = p_ref[4:5, :]
        return decay, vth0, v_reset, mask, strength

    d1, vth1, vr1, m1, st1 = lif_consts(p1_ref)
    d2, vth2, vr2, m2, st2 = lif_consts(p2_ref)

    # Homeostasis constants folded: vth += (batch_mean_rate_sum/100 - 0.1)*0.001
    # with rs accumulated as batch-SUM  ->  vth += rs*HOM_C - 1e-4.
    HOM_C = 0.001 / (100.0 * B)

    def lif_step(x_in, decay, v_reset, mask, strength, v, vth, rs):
        v = v * decay + x_in                              # neuronal_charge
        sb = v >= vth                                     # neuronal_fire
        spike = sb.astype(f32)
        v = jnp.where(sb, v_reset, v)
        vth = jnp.where(sb & mask, vth + strength, vth)   # adaptive threshold
        rs = rs + jnp.sum(spike, axis=0, keepdims=True)   # homeostasis (batch sum, XLU)
        vth = jnp.clip(vth + (rs * HOM_C - 1.0e-4), 0.5, 2.0)
        return spike, v, vth, rs

    # ---- layer-1 input linear hoisted over ALL time steps on the packed
    #      (T*B, H1) slab; K = I is tiny -> VPU broadcast-FMA, no MXU round trip.
    x_all = x_ref[...]                                    # (T*B, I)
    h1_all = x_all[:, 0:1] * w1_ref[0:1, :]
    for i in range(1, I):
        h1_all = h1_all + x_all[:, i:i + 1] * w1_ref[i:i + 1, :]
    h1_all = h1_all + b1_ref[...] + n1_ref[...]           # bias + heterogeneous noise

    # ---- layer-1 LIF recurrence (pure VPU); spikes packed into s1_buf slab.
    v1 = jnp.zeros((B, H1), f32)
    rs1 = jnp.zeros((1, H1), f32)
    for t in range(T):
        s1, v1, vth1, rs1 = lif_step(h1_all[t * B:(t + 1) * B, :],
                                     d1, vr1, m1, st1, v1, vth1, rs1)
        s1_buf[t * B:(t + 1) * B, :] = s1

    # ---- ONE batched MXU dot for layer-2 linear (M = T*B = 16).
    h2_all = (jnp.dot(s1_buf[...], w2_ref[...], preferred_element_type=f32)
              + b2_ref[...] + n2_ref[...])                # (T*B, H2)

    # ---- layer-2 LIF recurrence.
    v2 = jnp.zeros((B, H2), f32)
    rs2 = jnp.zeros((1, H2), f32)
    for t in range(T):
        s2, v2, vth2, rs2 = lif_step(h2_all[t * B:(t + 1) * B, :],
                                     d2, vr2, m2, st2, v2, vth2, rs2)
        s2_buf[t * B:(t + 1) * B, :] = s2

    # ---- ONE batched MXU dot for the output projection.
    o_all = jnp.dot(s2_buf[...], w3_ref[...], preferred_element_type=f32) + b3_ref[...]

    # ---- output LIF (tau=10, decay_input=True, v_th=1, v_reset=0) + time sum.
    vo = jnp.zeros((B, O), f32)
    acc = jnp.zeros((B, O), f32)
    for t in range(T):
        o = o_all[t * B:(t + 1) * B, :]
        vo = vo + (o - vo) * 0.1
        sbo = vo >= 1.0
        acc = acc + sbo.astype(f32)
        vo = jnp.where(sbo, 0.0, vo)

    out_ref[...] = acc                                    # single (B, O) store


@jax.jit
def innovative_soma_net(x_btf, noise1_2d, noise2_2d, params):
    """x_btf: (B, T, I) as in the PyTorch module.  noise slabs are (T*B, H)."""
    B, T, I = x_btf.shape
    H1 = params["w1"].shape[1]
    H2 = params["w2"].shape[1]
    O = params["w3"].shape[1]

    # Time-major (t*B + b) packing feeds the (T*B, H) slabs / batched dots.
    # This 128-byte repack is jit-fused with the custom call (no separate eager launch).
    x2d = jnp.transpose(x_btf, (1, 0, 2)).reshape(T * B, I)

    def vmem():
        return pl.BlockSpec(memory_space=pltpu.MemorySpace.VMEM)

    # Grid-less call: one launch, one whole-array VMEM block per tensor (<25 KB total).
    return pl.pallas_call(
        _soma_net_kernel,
        out_shape=jax.ShapeDtypeStruct((B, O), jnp.float32),
        in_specs=[vmem() for _ in range(11)],
        out_specs=vmem(),
        scratch_shapes=[pltpu.VMEM((T * B, H1), jnp.float32),   # s1 spike slab
                        pltpu.VMEM((T * B, H2), jnp.float32)],  # s2 spike slab
    )(x2d, noise1_2d, noise2_2d,
      params["w1"], params["b1"], params["p1"],
      params["w2"], params["b2"], params["p2"],
      params["w3"], params["b3"])


def init_params(key, input_size=2, hidden_sizes=(64, 32), output_size=2):
    H1, H2 = hidden_sizes
    ks = jax.random.split(key, 8)

    def linear(kw, kb, fan_in, fan_out):
        bound = 1.0 / np.sqrt(fan_in)
        w = jax.random.uniform(kw, (fan_in, fan_out), jnp.float32, -bound, bound)
        b = jax.random.uniform(kb, (1, fan_out), jnp.float32, -bound, bound)
        return w, b

    def lif_params(k, n, tau_rng, vth_rng, vreset_rng, adapt_ratio, noise_level):
        k1, k2, k3, k4, k5, k6 = jax.random.split(k, 6)
        tau = jax.random.uniform(k1, (n,), jnp.float32, tau_rng[0], tau_rng[1])
        vth = jax.random.uniform(k2, (n,), jnp.float32, vth_rng[0], vth_rng[1])
        vreset = jax.random.uniform(k3, (n,), jnp.float32, vreset_rng[0], vreset_rng[1])
        mask = (jax.random.uniform(k4, (n,), jnp.float32) < adapt_ratio).astype(jnp.float32)
        # TODO(synk): parent SomaHeterogeneousLIF adaptation-strength init is not shown;
        # deterministically sampled uniform(0, 0.1) here.
        strength = jax.random.uniform(k5, (n,), jnp.float32, 0.0, 0.1)
        noise_scales = jax.random.uniform(k6, (n,), jnp.float32) * noise_level
        return jnp.stack([tau, vth, vreset, mask, strength], axis=0), noise_scales

    w1, b1 = linear(ks[0], ks[1], input_size, H1)
    w2, b2 = linear(ks[2], ks[3], H1, H2)
    w3, b3 = linear(ks[4], ks[5], H2, output_size)
    p1, ns1 = lif_params(ks[6], H1, (2.0, 15.0), (0.7, 1.1), (-0.2, 0.0), 0.4, 0.02)
    p2, ns2 = lif_params(ks[7], H2, (5.0, 25.0), (0.9, 1.3), (-0.2, 0.0), 0.2, 0.01)
    params = dict(w1=w1, b1=b1, p1=p1, w2=w2, b2=b2, p2=p2, w3=w3, b3=b3)
    return params, ns1, ns2


def reference(x_btf, noise1_2d, noise2_2d, params):
    """Pure-JAX replica of the module's forward semantics (time-major loop)."""
    w1, b1, p1 = params["w1"], params["b1"], params["p1"]
    w2, b2, p2 = params["w2"], params["b2"], params["p2"]
    w3, b3 = params["w3"], params["b3"]
    B, T, _ = x_btf.shape
    H1, H2, O = w1.shape[1], w2.shape[1], w3.shape[1]
    noise1 = noise1_2d.reshape(T, B, H1)
    noise2 = noise2_2d.reshape(T, B, H2)

    def lif(inp_noisy, p, v, vth, rs):
        tau, v_reset, mask, strength = p[0:1], p[2:3], p[3:4], p[4:5]
        v = v * (1.0 - 1.0 / tau) + inp_noisy
        spike = (v >= vth).astype(jnp.float32)
        sb = spike > 0
        v = jnp.where(sb, jnp.zeros_like(v) + v_reset, v)
        vth = jnp.where(sb & (mask > 0), vth + strength, vth)
        rs = rs + spike.mean(axis=0, keepdims=True)
        vth = jnp.clip(vth + (rs / 100.0 - 0.1) * 0.001, 0.5, 2.0)
        return spike, v, vth, rs

    v1 = jnp.zeros((B, H1)); vth1 = jnp.zeros((B, H1)) + p1[1:2]; rs1 = jnp.zeros((1, H1))
    v2 = jnp.zeros((B, H2)); vth2 = jnp.zeros((B, H2)) + p2[1:2]; rs2 = jnp.zeros((1, H2))
    vo = jnp.zeros((B, O)); out = jnp.zeros((B, O))
    for t in range(T):
        cur = x_btf[:, t, :]
        s1, v1, vth1, rs1 = lif(cur @ w1 + b1 + noise1[t], p1, v1, vth1, rs1)
        s2, v2, vth2, rs2 = lif(s1 @ w2 + b2 + noise2[t], p2, v2, vth2, rs2)
        o = s2 @ w3 + b3
        vo = vo + (o - vo) / 10.0
        so = (vo >= 1.0).astype(jnp.float32)
        vo = jnp.where(so > 0, 0.0, vo)
        out = out + so
    return out


if __name__ == "__main__":
    key = jax.random.PRNGKey(0)
    B, T, I = 2, 8, 2
    H1, H2, O = 64, 32, 2
    k_x, k_p, k_n1, k_n2 = jax.random.split(key, 4)

    params, ns1, ns2 = init_params(k_p, input_size=I, hidden_sizes=(H1, H2), output_size=O)

    # deterministic example input (scaled so the heterogeneous LIF layers actually spike)
    x = 4.0 * jax.random.normal(k_x, (B, T, I), jnp.float32)
    # heterogeneous gaussian noise (torch.randn_like * per-neuron scale), precomputed
    # deterministically directly in the (T*B, H) time-major slab layout the kernel uses.
    noise1 = jax.random.normal(k_n1, (T * B, H1), jnp.float32) * ns1[None, :]
    noise2 = jax.random.normal(k_n2, (T * B, H2), jnp.float32) * ns2[None, :]

    out = jax.block_until_ready(innovative_soma_net(x, noise1, noise2, params))
    ref = jax.block_until_ready(reference(x, noise1, noise2, params))

    assert out.shape == (B, O)
    assert np.allclose(np.asarray(out), np.asarray(ref), atol=1e-3), (out, ref)
    print("KERNEL_OK")
</pallas_src>

<mosaic_0001>
module attributes {stable_mosaic.version = 11 : i64} {
  func.func @_soma_net_kernel(%arg0: memref<16x2xf32, #tpu.memory_space<vmem>>, %arg1: memref<16x64xf32, #tpu.memory_space<vmem>>, %arg2: memref<16x32xf32, #tpu.memory_space<vmem>>, %arg3: memref<2x64xf32, #tpu.memory_space<vmem>>, %arg4: memref<1x64xf32, #tpu.memory_space<vmem>>, %arg5: memref<5x64xf32, #tpu.memory_space<vmem>>, %arg6: memref<64x32xf32, #tpu.memory_space<vmem>>, %arg7: memref<1x32xf32, #tpu.memory_space<vmem>>, %arg8: memref<5x32xf32, #tpu.memory_space<vmem>>, %arg9: memref<32x2xf32, #tpu.memory_space<vmem>>, %arg10: memref<1x2xf32, #tpu.memory_space<vmem>>, %arg11: memref<2x2xf32, #tpu.memory_space<vmem>>, %arg12: memref<16x64xf32, #tpu.memory_space<vmem>>, %arg13: memref<16x32xf32, #tpu.memory_space<vmem>>) attributes {dimension_semantics = [], scalar_prefetch = 0 : i64, scratch_operands = 2 : i64, tpu.core_type = #tpu.core_type<tc>} {
    %c0 = arith.constant 0 : index
    %c0_0 = arith.constant 0 : index
    %0 = vector.load %arg5[%c0, %c0_0] : memref<5x64xf32, #tpu.memory_space<vmem>>, vector<1x64xf32>
    %cst = arith.constant 1.000000e+00 : f32
    %1 = vector.broadcast %cst : f32 to vector<1x64xf32>
    %2 = arith.divf %1, %0 : vector<1x64xf32>
    %cst_1 = arith.constant 1.000000e+00 : f32
    %3 = vector.broadcast %cst_1 : f32 to vector<1x64xf32>
    %4 = arith.subf %3, %2 : vector<1x64xf32>
    %c1 = arith.constant 1 : index
    %c0_2 = arith.constant 0 : index
    %5 = vector.load %arg5[%c1, %c0_2] : memref<5x64xf32, #tpu.memory_space<vmem>>, vector<1x64xf32>
    %c2 = arith.constant 2 : index
    %c0_3 = arith.constant 0 : index
    %6 = vector.load %arg5[%c2, %c0_3] : memref<5x64xf32, #tpu.memory_space<vmem>>, vector<1x64xf32>
    %c3 = arith.constant 3 : index
    %c0_4 = arith.constant 0 : index
    %7 = vector.load %arg5[%c3, %c0_4] : memref<5x64xf32, #tpu.memory_space<vmem>>, vector<1x64xf32>
    %cst_5 = arith.constant 0.000000e+00 : f32
    %8 = vector.broadcast %cst_5 : f32 to vector<1x64xf32>
    %9 = arith.cmpf ogt, %7, %8 : vector<1x64xf32>
    %c4 = arith.constant 4 : index
    %c0_6 = arith.constant 0 : index
    %10 = vector.load %arg5[%c4, %c0_6] : memref<5x64xf32, #tpu.memory_space<vmem>>, vector<1x64xf32>
    %c0_7 = arith.constant 0 : index
    %c0_8 = arith.constant 0 : index
    %11 = vector.load %arg8[%c0_7, %c0_8] : memref<5x32xf32, #tpu.memory_space<vmem>>, vector<1x32xf32>
    %cst_9 = arith.constant 1.000000e+00 : f32
    %12 = vector.broadcast %cst_9 : f32 to vector<1x32xf32>
    %13 = arith.divf %12, %11 : vector<1x32xf32>
    %cst_10 = arith.constant 1.000000e+00 : f32
    %14 = vector.broadcast %cst_10 : f32 to vector<1x32xf32>
    %15 = arith.subf %14, %13 : vector<1x32xf32>
    %c1_11 = arith.constant 1 : index
    %c0_12 = arith.constant 0 : index
    %16 = vector.load %arg8[%c1_11, %c0_12] : memref<5x32xf32, #tpu.memory_space<vmem>>, vector<1x32xf32>
    %c2_13 = arith.constant 2 : index
    %c0_14 = arith.constant 0 : index
    %17 = vector.load %arg8[%c2_13, %c0_14] : memref<5x32xf32, #tpu.memory_space<vmem>>, vector<1x32xf32>
    %c3_15 = arith.constant 3 : index
    %c0_16 = arith.constant 0 : index
    %18 = vector.load %arg8[%c3_15, %c0_16] : memref<5x32xf32, #tpu.memory_space<vmem>>, vector<1x32xf32>
    %cst_17 = arith.constant 0.000000e+00 : f32
    %19 = vector.broadcast %cst_17 : f32 to vector<1x32xf32>
    %20 = arith.cmpf ogt, %18, %19 : vector<1x32xf32>
    %c4_18 = arith.constant 4 : index
    %c0_19 = arith.constant 0 : index
    %21 = vector.load %arg8[%c4_18, %c0_19] : memref<5x32xf32, #tpu.memory_space<vmem>>, vector<1x32xf32>
    %c0_20 = arith.constant 0 : index
    %c0_21 = arith.constant 0 : index
    %22 = vector.load %arg0[%c0_20, %c0_21] : memref<16x2xf32, #tpu.memory_space<vmem>>, vector<16x2xf32>
    %23 = vector.extract_strided_slice %22 {offsets = [0, 0], sizes = [16, 1], strides = [1, 1]} : vector<16x2xf32> to vector<16x1xf32>
    %c0_22 = arith.constant 0 : index
    %c0_23 = arith.constant 0 : index
    %24 = vector.load %arg3[%c0_22, %c0_23] : memref<2x64xf32, #tpu.memory_space<vmem>>, vector<1x64xf32>
    %25 = vector.broadcast %23 : vector<16x1xf32> to vector<16x64xf32>
    %26 = vector.broadcast %24 : vector<1x64xf32> to vector<16x64xf32>
    %27 = arith.mulf %25, %26 : vector<16x64xf32>
    %28 = vector.extract_strided_slice %22 {offsets = [0, 1], sizes = [16, 1], strides = [1, 1]} : vector<16x2xf32> to vector<16x1xf32>
    %c1_24 = arith.constant 1 : index
    %c0_25 = arith.constant 0 : index
    %29 = vector.load %arg3[%c1_24, %c0_25] : memref<2x64xf32, #tpu.memory_space<vmem>>, vector<1x64xf32>
    %30 = vector.broadcast %28 : vector<16x1xf32> to vector<16x64xf32>
    %31 = vector.broadcast %29 : vector<1x64xf32> to vector<16x64xf32>
    %32 = arith.mulf %30, %31 : vector<16x64xf32>
    %33 = arith.addf %27, %32 : vector<16x64xf32>
    %c0_26 = arith.constant 0 : index
    %c0_27 = arith.constant 0 : index
    %34 = vector.load %arg4[%c0_26, %c0_27] : memref<1x64xf32, #tpu.memory_space<vmem>>, vector<1x64xf32>
    %35 = vector.broadcast %34 : vector<1x64xf32> to vector<16x64xf32>
    %36 = arith.addf %33, %35 : vector<16x64xf32>
    %c0_28 = arith.constant 0 : index
    %c0_29 = arith.constant 0 : index
    %37 = vector.load %arg1[%c0_28, %c0_29] : memref<16x64xf32, #tpu.memory_space<vmem>>, vector<16x64xf32>
    %38 = arith.addf %36, %37 : vector<16x64xf32>
    %cst_30 = arith.constant 0.000000e+00 : f32
    %39 = vector.broadcast %cst_30 : f32 to vector<2x64xf32>
    %cst_31 = arith.constant 0.000000e+00 : f32
    %40 = vector.broadcast %cst_31 : f32 to vector<1x64xf32>
    %41 = vector.extract_strided_slice %38 {offsets = [0, 0], sizes = [2, 64], strides = [1, 1]} : vector<16x64xf32> to vector<2x64xf32>
    %42 = vector.broadcast %4 : vector<1x64xf32> to vector<2x64xf32>
    %43 = arith.mulf %39, %42 : vector<2x64xf32>
    %44 = arith.addf %43, %41 : vector<2x64xf32>
    %45 = vector.broadcast %5 : vector<1x64xf32> to vector<2x64xf32>
    %46 = arith.cmpf oge, %44, %45 : vector<2x64xf32>
    %47 = arith.extui %46 : vector<2x64xi1> to vector<2x64xi32>
    %48 = arith.sitofp %47 : vector<2x64xi32> to vector<2x64xf32>
    %49 = vector.shape_cast %6 : vector<1x64xf32> to vector<1x64xf32>
    %50 = vector.broadcast %49 : vector<1x64xf32> to vector<2x64xf32>
    %51 = arith.select %46, %50, %44 : vector<2x64xi1>, vector<2x64xf32>
    %52 = vector.broadcast %9 : vector<1x64xi1> to vector<2x64xi1>
    %53 = arith.andi %46, %52 : vector<2x64xi1>
    %54 = arith.addf %5, %10 : vector<1x64xf32>
    %55 = vector.shape_cast %54 : vector<1x64xf32> to vector<1x64xf32>
    %56 = vector.broadcast %55 : vector<1x64xf32> to vector<2x64xf32>
    %57 = vector.shape_cast %5 : vector<1x64xf32> to vector<1x64xf32>
    %58 = vector.broadcast %57 : vector<1x64xf32> to vector<2x64xf32>
    %59 = arith.select %53, %56, %58 : vector<2x64xi1>, vector<2x64xf32>
    %cst_32 = arith.constant dense<0.000000e+00> : vector<64xf32>
    %60 = vector.multi_reduction <add>, %48, %cst_32 [0] : vector<2x64xf32> to vector<64xf32>
    %61 = vector.shape_cast %60 : vector<64xf32> to vector<1x64xf32>
    %62 = arith.addf %40, %61 : vector<1x64xf32>
    %cst_33 = arith.constant 5.000000e-06 : f32
    %63 = vector.broadcast %cst_33 : f32 to vector<1x64xf32>
    %64 = arith.mulf %62, %63 : vector<1x64xf32>
    %cst_34 = arith.constant 9.99999974E-5 : f32
    %65 = vector.broadcast %cst_34 : f32 to vector<1x64xf32>
    %66 = arith.subf %64, %65 : vector<1x64xf32>
    %67 = vector.broadcast %66 : vector<1x64xf32> to vector<2x64xf32>
    %68 = arith.addf %59, %67 : vector<2x64xf32>
    %cst_35 = arith.constant 5.000000e-01 : f32
    %cst_36 = arith.constant 2.000000e+00 : f32
    %69 = vector.broadcast %cst_35 : f32 to vector<2x64xf32>
    %70 = arith.maximumf %69, %68 : vector<2x64xf32>
    %71 = vector.broadcast %cst_36 : f32 to vector<2x64xf32>
    %72 = arith.minimumf %71, %70 : vector<2x64xf32>
    %c0_37 = arith.constant 0 : index
    %c0_38 = arith.constant 0 : index
    %73 = vector.load %arg12[%c0_37, %c0_38] : memref<16x64xf32, #tpu.memory_space<vmem>>, vector<2x64xf32>
    tpu.vector_store %arg12[%c0_37, %c0_38], %48 {strides = array<i32>} : memref<16x64xf32, #tpu.memory_space<vmem>>, vector<2x64xf32>,
    %74 = vector.extract_strided_slice %38 {offsets = [2, 0], sizes = [2, 64], strides = [1, 1]} : vector<16x64xf32> to vector<2x64xf32>
    %75 = vector.broadcast %4 : vector<1x64xf32> to vector<2x64xf32>
    %76 = arith.mulf %51, %75 : vector<2x64xf32>
    %77 = arith.addf %76, %74 : vector<2x64xf32>
    %78 = arith.cmpf oge, %77, %72 : vector<2x64xf32>
    %79 = arith.extui %78 : vector<2x64xi1> to vector<2x64xi32>
    %80 = arith.sitofp %79 : vector<2x64xi32> to vector<2x64xf32>
    %81 = vector.shape_cast %6 : vector<1x64xf32> to vector<1x64xf32>
    %82 = vector.broadcast %81 : vector<1x64xf32> to vector<2x64xf32>
    %83 = arith.select %78, %82, %77 : vector<2x64xi1>, vector<2x64xf32>
    %84 = vector.broadcast %9 : vector<1x64xi1> to vector<2x64xi1>
    %85 = arith.andi %78, %84 : vector<2x64xi1>
    %86 = vector.broadcast %10 : vector<1x64xf32> to vector<2x64xf32>
    %87 = arith.addf %72, %86 : vector<2x64xf32>
    %88 = arith.select %85, %87, %72 : vector<2x64xi1>, vector<2x64xf32>
    %cst_39 = arith.constant dense<0.000000e+00> : vector<64xf32>
    %89 = vector.multi_reduction <add>, %80, %cst_39 [0] : vector<2x64xf32> to vector<64xf32>
    %90 = vector.shape_cast %89 : vector<64xf32> to vector<1x64xf32>
    %91 = arith.addf %62, %90 : vector<1x64xf32>
    %cst_40 = arith.constant 5.000000e-06 : f32
    %92 = vector.broadcast %cst_40 : f32 to vector<1x64xf32>
    %93 = arith.mulf %91, %92 : vector<1x64xf32>
    %cst_41 = arith.constant 9.99999974E-5 : f32
    %94 = vector.broadcast %cst_41 : f32 to vector<1x64xf32>
    %95 = arith.subf %93, %94 : vector<1x64xf32>
    %96 = vector.broadcast %95 : vector<1x64xf32> to vector<2x64xf32>
    %97 = arith.addf %88, %96 : vector<2x64xf32>
    %cst_42 = arith.constant 5.000000e-01 : f32
    %cst_43 = arith.constant 2.000000e+00 : f32
    %98 = vector.broadcast %cst_42 : f32 to vector<2x64xf32>
    %99 = arith.maximumf %98, %97 : vector<2x64xf32>
    %100 = vector.broadcast %cst_43 : f32 to vector<2x64xf32>
    %101 = arith.minimumf %100, %99 : vector<2x64xf32>
    %c2_44 = arith.constant 2 : index
    %c0_45 = arith.constant 0 : index
    %102 = vector.load %arg12[%c2_44, %c0_45] : memref<16x64xf32, #tpu.memory_space<vmem>>, vector<2x64xf32>
    tpu.vector_store %arg12[%c2_44, %c0_45], %80 {strides = array<i32>} : memref<16x64xf32, #tpu.memory_space<vmem>>, vector<2x64xf32>,
    %103 = vector.extract_strided_slice %38 {offsets = [4, 0], sizes = [2, 64], strides = [1, 1]} : vector<16x64xf32> to vector<2x64xf32>
    %104 = vector.broadcast %4 : vector<1x64xf32> to vector<2x64xf32>
    %105 = arith.mulf %83, %104 : vector<2x64xf32>
    %106 = arith.addf %105, %103 : vector<2x64xf32>
    %107 = arith.cmpf oge, %106, %101 : vector<2x64xf32>
    %108 = arith.extui %107 : vector<2x64xi1> to vector<2x64xi32>
    %109 = arith.sitofp %108 : vector<2x64xi32> to vector<2x64xf32>
    %110 = vector.shape_cast %6 : vector<1x64xf32> to vector<1x64xf32>
    %111 = vector.broadcast %110 : vector<1x64xf32> to vector<2x64xf32>
    %112 = arith.select %107, %111, %106 : vector<2x64xi1>, vector<2x64xf32>
    %113 = vector.broadcast %9 : vector<1x64xi1> to vector<2x64xi1>
    %114 = arith.andi %107, %113 : vector<2x64xi1>
    %115 = vector.broadcast %10 : vector<1x64xf32> to vector<2x64xf32>
    %116 = arith.addf %101, %115 : vector<2x64xf32>
    %117 = arith.select %114, %116, %101 : vector<2x64xi1>, vector<2x64xf32>
    %cst_46 = arith.constant dense<0.000000e+00> : vector<64xf32>
    %118 = vector.multi_reduction <add>, %109, %cst_46 [0] : vector<2x64xf32> to vector<64xf32>
    %119 = vector.shape_cast %118 : vector<64xf32> to vector<1x64xf32>
    %120 = arith.addf %91, %119 : vector<1x64xf32>
    %cst_47 = arith.constant 5.000000e-06 : f32
    %121 = vector.broadcast %cst_47 : f32 to vector<1x64xf32>
    %122 = arith.mulf %120, %121 : vector<1x64xf32>
    %cst_48 = arith.constant 9.99999974E-5 : f32
    %123 = vector.broadcast %cst_48 : f32 to vector<1x64xf32>
    %124 = arith.subf %122, %123 : vector<1x64xf32>
    %125 = vector.broadcast %124 : vector<1x64xf32> to vector<2x64xf32>
    %126 = arith.addf %117, %125 : vector<2x64xf32>
    %cst_49 = arith.constant 5.000000e-01 : f32
    %cst_50 = arith.constant 2.000000e+00 : f32
    %127 = vector.broadcast %cst_49 : f32 to vector<2x64xf32>
    %128 = arith.maximumf %127, %126 : vector<2x64xf32>
    %129 = vector.broadcast %cst_50 : f32 to vector<2x64xf32>
    %130 = arith.minimumf %129, %128 : vector<2x64xf32>
    %c4_51 = arith.constant 4 : index
    %c0_52 = arith.constant 0 : index
    %131 = vector.load %arg12[%c4_51, %c0_52] : memref<16x64xf32, #tpu.memory_space<vmem>>, vector<2x64xf32>
    tpu.vector_store %arg12[%c4_51, %c0_52], %109 {strides = array<i32>} : memref<16x64xf32, #tpu.memory_space<vmem>>, vector<2x64xf32>,
    %132 = vector.extract_strided_slice %38 {offsets = [6, 0], sizes = [2, 64], strides = [1, 1]} : vector<16x64xf32> to vector<2x64xf32>
    %133 = vector.broadcast %4 : vector<1x64xf32> to vector<2x64xf32>
    %134 = arith.mulf %112, %133 : vector<2x64xf32>
    %135 = arith.addf %134, %132 : vector<2x64xf32>
    %136 = arith.cmpf oge, %135, %130 : vector<2x64xf32>
    %137 = arith.extui %136 : vector<2x64xi1> to vector<2x64xi32>
    %138 = arith.sitofp %137 : vector<2x64xi32> to vector<2x64xf32>
    %139 = vector.shape_cast %6 : vector<1x64xf32> to vector<1x64xf32>
    %140 = vector.broadcast %139 : vector<1x64xf32> to vector<2x64xf32>
    %141 = arith.select %136, %140, %135 : vector<2x64xi1>, vector<2x64xf32>
    %142 = vector.broadcast %9 : vector<1x64xi1> to vector<2x64xi1>
    %143 = arith.andi %136, %142 : vector<2x64xi1>
    %144 = vector.broadcast %10 : vector<1x64xf32> to vector<2x64xf32>
    %145 = arith.addf %130, %144 : vector<2x64xf32>
    %146 = arith.select %143, %145, %130 : vector<2x64xi1>, vector<2x64xf32>
    %cst_53 = arith.constant dense<0.000000e+00> : vector<64xf32>
    %147 = vector.multi_reduction <add>, %138, %cst_53 [0] : vector<2x64xf32> to vector<64xf32>
    %148 = vector.shape_cast %147 : vector<64xf32> to vector<1x64xf32>
    %149 = arith.addf %120, %148 : vector<1x64xf32>
    %cst_54 = arith.constant 5.000000e-06 : f32
    %150 = vector.broadcast %cst_54 : f32 to vector<1x64xf32>
    %151 = arith.mulf %149, %150 : vector<1x64xf32>
    %cst_55 = arith.constant 9.99999974E-5 : f32
    %152 = vector.broadcast %cst_55 : f32 to vector<1x64xf32>
    %153 = arith.subf %151, %152 : vector<1x64xf32>
    %154 = vector.broadcast %153 : vector<1x64xf32> to vector<2x64xf32>
    %155 = arith.addf %146, %154 : vector<2x64xf32>
    %cst_56 = arith.constant 5.000000e-01 : f32
    %cst_57 = arith.constant 2.000000e+00 : f32
    %156 = vector.broadcast %cst_56 : f32 to vector<2x64xf32>
    %157 = arith.maximumf %156, %155 : vector<2x64xf32>
    %158 = vector.broadcast %cst_57 : f32 to vector<2x64xf32>
    %159 = arith.minimumf %158, %157 : vector<2x64xf32>
    %c6 = arith.constant 6 : index
    %c0_58 = arith.constant 0 : index
    %160 = vector.load %arg12[%c6, %c0_58] : memref<16x64xf32, #tpu.memory_space<vmem>>, vector<2x64xf32>
    tpu.vector_store %arg12[%c6, %c0_58], %138 {strides = array<i32>} : memref<16x64xf32, #tpu.memory_space<vmem>>, vector<2x64xf32>,
    %161 = vector.extract_strided_slice %38 {offsets = [8, 0], sizes = [2, 64], strides = [1, 1]} : vector<16x64xf32> to vector<2x64xf32>
    %162 = vector.broadcast %4 : vector<1x64xf32> to vector<2x64xf32>
    %163 = arith.mulf %141, %162 : vector<2x64xf32>
    %164 = arith.addf %163, %161 : vector<2x64xf32>
    %165 = arith.cmpf oge, %164, %159 : vector<2x64xf32>
    %166 = arith.extui %165 : vector<2x64xi1> to vector<2x64xi32>
    %167 = arith.sitofp %166 : vector<2x64xi32> to vector<2x64xf32>
    %168 = vector.shape_cast %6 : vector<1x64xf32> to vector<1x64xf32>
    %169 = vector.broadcast %168 : vector<1x64xf32> to vector<2x64xf32>
    %170 = arith.select %165, %169, %164 : vector<2x64xi1>, vector<2x64xf32>
    %171 = vector.broadcast %9 : vector<1x64xi1> to vector<2x64xi1>
    %172 = arith.andi %165, %171 : vector<2x64xi1>
    %173 = vector.broadcast %10 : vector<1x64xf32> to vector<2x64xf32>
    %174 = arith.addf %159, %173 : vector<2x64xf32>
    %175 = arith.select %172, %174, %159 : vector<2x64xi1>, vector<2x64xf32>
    %cst_59 = arith.constant dense<0.000000e+00> : vector<64xf32>
    %176 = vector.multi_reduction <add>, %167, %cst_59 [0] : vector<2x64xf32> to vector<64xf32>
    %177 = vector.shape_cast %176 : vector<64xf32> to vector<1x64xf32>
    %178 = arith.addf %149, %177 : vector<1x64xf32>
    %cst_60 = arith.constant 5.000000e-06 : f32
    %179 = vector.broadcast %cst_60 : f32 to vector<1x64xf32>
    %180 = arith.mulf %178, %179 : vector<1x64xf32>
    %cst_61 = arith.constant 9.99999974E-5 : f32
    %181 = vector.broadcast %cst_61 : f32 to vector<1x64xf32>
    %182 = arith.subf %180, %181 : vector<1x64xf32>
    %183 = vector.broadcast %182 : vector<1x64xf32> to vector<2x64xf32>
    %184 = arith.addf %175, %183 : vector<2x64xf32>
    %cst_62 = arith.constant 5.000000e-01 : f32
    %cst_63 = arith.constant 2.000000e+00 : f32
    %185 = vector.broadcast %cst_62 : f32 to vector<2x64xf32>
    %186 = arith.maximumf %185, %184 : vector<2x64xf32>
    %187 = vector.broadcast %cst_63 : f32 to vector<2x64xf32>
    %188 = arith.minimumf %187, %186 : vector<2x64xf32>
    %c8 = arith.constant 8 : index
    %c0_64 = arith.constant 0 : index
    %189 = vector.load %arg12[%c8, %c0_64] : memref<16x64xf32, #tpu.memory_space<vmem>>, vector<2x64xf32>
    tpu.vector_store %arg12[%c8, %c0_64], %167 {strides = array<i32>} : memref<16x64xf32, #tpu.memory_space<vmem>>, vector<2x64xf32>,
    %190 = vector.extract_strided_slice %38 {offsets = [10, 0], sizes = [2, 64], strides = [1, 1]} : vector<16x64xf32> to vector<2x64xf32>
    %191 = vector.broadcast %4 : vector<1x64xf32> to vector<2x64xf32>
    %192 = arith.mulf %170, %191 : vector<2x64xf32>
    %193 = arith.addf %192, %190 : vector<2x64xf32>
    %194 = arith.cmpf oge, %193, %188 : vector<2x64xf32>
    %195 = arith.extui %194 : vector<2x64xi1> to vector<2x64xi32>
    %196 = arith.sitofp %195 : vector<2x64xi32> to vector<2x64xf32>
    %197 = vector.shape_cast %6 : vector<1x64xf32> to vector<1x64xf32>
    %198 = vector.broadcast %197 : vector<1x64xf32> to vector<2x64xf32>
    %199 = arith.select %194, %198, %193 : vector<2x64xi1>, vector<2x64xf32>
    %200 = vector.broadcast %9 : vector<1x64xi1> to vector<2x64xi1>
    %201 = arith.andi %194, %200 : vector<2x64xi1>
    %202 = vector.broadcast %10 : vector<1x64xf32> to vector<2x64xf32>
    %203 = arith.addf %188, %202 : vector<2x64xf32>
    %204 = arith.select %201, %203, %188 : vector<2x64xi1>, vector<2x64xf32>
    %cst_65 = arith.constant dense<0.000000e+00> : vector<64xf32>
    %205 = vector.multi_reduction <add>, %196, %cst_65 [0] : vector<2x64xf32> to vector<64xf32>
    %206 = vector.shape_cast %205 : vector<64xf32> to vector<1x64xf32>
    %207 = arith.addf %178, %206 : vector<1x64xf32>
    %cst_66 = arith.constant 5.000000e-06 : f32
    %208 = vector.broadcast %cst_66 : f32 to vector<1x64xf32>
    %209 = arith.mulf %207, %208 : vector<1x64xf32>
    %cst_67 = arith.constant 9.99999974E-5 : f32
    %210 = vector.broadcast %cst_67 : f32 to vector<1x64xf32>
    %211 = arith.subf %209, %210 : vector<1x64xf32>
    %212 = vector.broadcast %211 : vector<1x64xf32> to vector<2x64xf32>
    %213 = arith.addf %204, %212 : vector<2x64xf32>
    %cst_68 = arith.constant 5.000000e-01 : f32
    %cst_69 = arith.constant 2.000000e+00 : f32
    %214 = vector.broadcast %cst_68 : f32 to vector<2x64xf32>
    %215 = arith.maximumf %214, %213 : vector<2x64xf32>
    %216 = vector.broadcast %cst_69 : f32 to vector<2x64xf32>
    %217 = arith.minimumf %216, %215 : vector<2x64xf32>
    %c10 = arith.constant 10 : index
    %c0_70 = arith.constant 0 : index
    %218 = vector.load %arg12[%c10, %c0_70] : memref<16x64xf32, #tpu.memory_space<vmem>>, vector<2x64xf32>
    tpu.vector_store %arg12[%c10, %c0_70], %196 {strides = array<i32>} : memref<16x64xf32, #tpu.memory_space<vmem>>, vector<2x64xf32>,
    %219 = vector.extract_strided_slice %38 {offsets = [12, 0], sizes = [2, 64], strides = [1, 1]} : vector<16x64xf32> to vector<2x64xf32>
    %220 = vector.broadcast %4 : vector<1x64xf32> to vector<2x64xf32>
    %221 = arith.mulf %199, %220 : vector<2x64xf32>
    %222 = arith.addf %221, %219 : vector<2x64xf32>
    %223 = arith.cmpf oge, %222, %217 : vector<2x64xf32>
    %224 = arith.extui %223 : vector<2x64xi1> to vector<2x64xi32>
    %225 = arith.sitofp %224 : vector<2x64xi32> to vector<2x64xf32>
    %226 = vector.shape_cast %6 : vector<1x64xf32> to vector<1x64xf32>
    %227 = vector.broadcast %226 : vector<1x64xf32> to vector<2x64xf32>
    %228 = arith.select %223, %227, %222 : vector<2x64xi1>, vector<2x64xf32>
    %229 = vector.broadcast %9 : vector<1x64xi1> to vector<2x64xi1>
    %230 = arith.andi %223, %229 : vector<2x64xi1>
    %231 = vector.broadcast %10 : vector<1x64xf32> to vector<2x64xf32>
    %232 = arith.addf %217, %231 : vector<2x64xf32>
    %233 = arith.select %230, %232, %217 : vector<2x64xi1>, vector<2x64xf32>
    %cst_71 = arith.constant dense<0.000000e+00> : vector<64xf32>
    %234 = vector.multi_reduction <add>, %225, %cst_71 [0] : vector<2x64xf32> to vector<64xf32>
    %235 = vector.shape_cast %234 : vector<64xf32> to vector<1x64xf32>
    %236 = arith.addf %207, %235 : vector<1x64xf32>
    %cst_72 = arith.constant 5.000000e-06 : f32
    %237 = vector.broadcast %cst_72 : f32 to vector<1x64xf32>
    %238 = arith.mulf %236, %237 : vector<1x64xf32>
    %cst_73 = arith.constant 9.99999974E-5 : f32
    %239 = vector.broadcast %cst_73 : f32 to vector<1x64xf32>
    %240 = arith.subf %238, %239 : vector<1x64xf32>
    %241 = vector.broadcast %240 : vector<1x64xf32> to vector<2x64xf32>
    %242 = arith.addf %233, %241 : vector<2x64xf32>
    %cst_74 = arith.constant 5.000000e-01 : f32
    %cst_75 = arith.constant 2.000000e+00 : f32
    %243 = vector.broadcast %cst_74 : f32 to vector<2x64xf32>
    %244 = arith.maximumf %243, %242 : vector<2x64xf32>
    %245 = vector.broadcast %cst_75 : f32 to vector<2x64xf32>
    %246 = arith.minimumf %245, %244 : vector<2x64xf32>
    %c12 = arith.constant 12 : index
    %c0_76 = arith.constant 0 : index
    %247 = vector.load %arg12[%c12, %c0_76] : memref<16x64xf32, #tpu.memory_space<vmem>>, vector<2x64xf32>
    tpu.vector_store %arg12[%c12, %c0_76], %225 {strides = array<i32>} : memref<16x64xf32, #tpu.memory_space<vmem>>, vector<2x64xf32>,
    %248 = vector.extract_strided_slice %38 {offsets = [14, 0], sizes = [2, 64], strides = [1, 1]} : vector<16x64xf32> to vector<2x64xf32>
    %249 = vector.broadcast %4 : vector<1x64xf32> to vector<2x64xf32>
    %250 = arith.mulf %228, %249 : vector<2x64xf32>
    %251 = arith.addf %250, %248 : vector<2x64xf32>
    %252 = arith.cmpf oge, %251, %246 : vector<2x64xf32>
    %253 = arith.extui %252 : vector<2x64xi1> to vector<2x64xi32>
    %254 = arith.sitofp %253 : vector<2x64xi32> to vector<2x64xf32>
    %c14 = arith.constant 14 : index
    %c0_77 = arith.constant 0 : index
    %255 = vector.load %arg12[%c14, %c0_77] : memref<16x64xf32, #tpu.memory_space<vmem>>, vector<2x64xf32>
    tpu.vector_store %arg12[%c14, %c0_77], %254 {strides = array<i32>} : memref<16x64xf32, #tpu.memory_space<vmem>>, vector<2x64xf32>,
    %c0_78 = arith.constant 0 : index
    %c0_79 = arith.constant 0 : index
    %256 = vector.load %arg12[%c0_78, %c0_79] : memref<16x64xf32, #tpu.memory_space<vmem>>, vector<16x64xf32>
    %c0_80 = arith.constant 0 : index
    %c0_81 = arith.constant 0 : index
    %257 = vector.load %arg6[%c0_80, %c0_81] : memref<64x32xf32, #tpu.memory_space<vmem>>, vector<64x32xf32>
    %cst_82 = arith.constant dense<0.000000e+00> : vector<16x32xf32>
    %258 = tpu.matmul %256, %257, %cst_82 {dimension_numbers = #tpu.dot_dimension_numbers<[1], [0], [0], [1], [0, 0, 1, 1], [], []>, precision = #tpu.contract_precision<fp32>} : vector<16x64xf32>, vector<64x32xf32>, vector<16x32xf32> -> vector<16x32xf32>
    %c0_83 = arith.constant 0 : index
    %c0_84 = arith.constant 0 : index
    %259 = vector.load %arg7[%c0_83, %c0_84] : memref<1x32xf32, #tpu.memory_space<vmem>>, vector<1x32xf32>
    %260 = vector.broadcast %259 : vector<1x32xf32> to vector<16x32xf32>
    %261 = arith.addf %258, %260 : vector<16x32xf32>
    %c0_85 = arith.constant 0 : index
    %c0_86 = arith.constant 0 : index
    %262 = vector.load %arg2[%c0_85, %c0_86] : memref<16x32xf32, #tpu.memory_space<vmem>>, vector<16x32xf32>
    %263 = arith.addf %261, %262 : vector<16x32xf32>
    %cst_87 = arith.constant 0.000000e+00 : f32
    %264 = vector.broadcast %cst_87 : f32 to vector<2x32xf32>
    %cst_88 = arith.constant 0.000000e+00 : f32
    %265 = vector.broadcast %cst_88 : f32 to vector<1x32xf32>
    %266 = vector.extract_strided_slice %263 {offsets = [0, 0], sizes = [2, 32], strides = [1, 1]} : vector<16x32xf32> to vector<2x32xf32>
    %267 = vector.broadcast %15 : vector<1x32xf32> to vector<2x32xf32>
    %268 = arith.mulf %264, %267 : vector<2x32xf32>
    %269 = arith.addf %268, %266 : vector<2x32xf32>
    %270 = vector.broadcast %16 : vector<1x32xf32> to vector<2x32xf32>
    %271 = arith.cmpf oge, %269, %270 : vector<2x32xf32>
    %272 = arith.extui %271 : vector<2x32xi1> to vector<2x32xi32>
    %273 = arith.sitofp %272 : vector<2x32xi32> to vector<2x32xf32>
    %274 = vector.shape_cast %17 : vector<1x32xf32> to vector<1x32xf32>
    %275 = vector.broadcast %274 : vector<1x32xf32> to vector<2x32xf32>
    %276 = arith.select %271, %275, %269 : vector<2x32xi1>, vector<2x32xf32>
    %277 = vector.broadcast %20 : vector<1x32xi1> to vector<2x32xi1>
    %278 = arith.andi %271, %277 : vector<2x32xi1>
    %279 = arith.addf %16, %21 : vector<1x32xf32>
    %280 = vector.shape_cast %279 : vector<1x32xf32> to vector<1x32xf32>
    %281 = vector.broadcast %280 : vector<1x32xf32> to vector<2x32xf32>
    %282 = vector.shape_cast %16 : vector<1x32xf32> to vector<1x32xf32>
    %283 = vector.broadcast %282 : vector<1x32xf32> to vector<2x32xf32>
    %284 = arith.select %278, %281, %283 : vector<2x32xi1>, vector<2x32xf32>
    %cst_89 = arith.constant dense<0.000000e+00> : vector<32xf32>
    %285 = vector.multi_reduction <add>, %273, %cst_89 [0] : vector<2x32xf32> to vector<32xf32>
    %286 = vector.shape_cast %285 : vector<32xf32> to vector<1x32xf32>
    %287 = arith.addf %265, %286 : vector<1x32xf32>
    %cst_90 = arith.constant 5.000000e-06 : f32
    %288 = vector.broadcast %cst_90 : f32 to vector<1x32xf32>
    %289 = arith.mulf %287, %288 : vector<1x32xf32>
    %cst_91 = arith.constant 9.99999974E-5 : f32
    %290 = vector.broadcast %cst_91 : f32 to vector<1x32xf32>
    %291 = arith.subf %289, %290 : vector<1x32xf32>
    %292 = vector.broadcast %291 : vector<1x32xf32> to vector<2x32xf32>
    %293 = arith.addf %284, %292 : vector<2x32xf32>
    %cst_92 = arith.constant 5.000000e-01 : f32
    %cst_93 = arith.constant 2.000000e+00 : f32
    %294 = vector.broadcast %cst_92 : f32 to vector<2x32xf32>
    %295 = arith.maximumf %294, %293 : vector<2x32xf32>
    %296 = vector.broadcast %cst_93 : f32 to vector<2x32xf32>
    %297 = arith.minimumf %296, %295 : vector<2x32xf32>
    %c0_94 = arith.constant 0 : index
    %c0_95 = arith.constant 0 : index
    %298 = vector.load %arg13[%c0_94, %c0_95] : memref<16x32xf32, #tpu.memory_space<vmem>>, vector<2x32xf32>
    tpu.vector_store %arg13[%c0_94, %c0_95], %273 {strides = array<i32>} : memref<16x32xf32, #tpu.memory_space<vmem>>, vector<2x32xf32>,
    %299 = vector.extract_strided_slice %263 {offsets = [2, 0], sizes = [2, 32], strides = [1, 1]} : vector<16x32xf32> to vector<2x32xf32>
    %300 = vector.broadcast %15 : vector<1x32xf32> to vector<2x32xf32>
    %301 = arith.mulf %276, %300 : vector<2x32xf32>
    %302 = arith.addf %301, %299 : vector<2x32xf32>
    %303 = arith.cmpf oge, %302, %297 : vector<2x32xf32>
    %304 = arith.extui %303 : vector<2x32xi1> to vector<2x32xi32>
    %305 = arith.sitofp %304 : vector<2x32xi32> to vector<2x32xf32>
    %306 = vector.shape_cast %17 : vector<1x32xf32> to vector<1x32xf32>
    %307 = vector.broadcast %306 : vector<1x32xf32> to vector<2x32xf32>
    %308 = arith.select %303, %307, %302 : vector<2x32xi1>, vector<2x32xf32>
    %309 = vector.broadcast %20 : vector<1x32xi1> to vector<2x32xi1>
    %310 = arith.andi %303, %309 : vector<2x32xi1>
    %311 = vector.broadcast %21 : vector<1x32xf32> to vector<2x32xf32>
    %312 = arith.addf %297, %311 : vector<2x32xf32>
    %313 = arith.select %310, %312, %297 : vector<2x32xi1>, vector<2x32xf32>
    %cst_96 = arith.constant dense<0.000000e+00> : vector<32xf32>
    %314 = vector.multi_reduction <add>, %305, %cst_96 [0] : vector<2x32xf32> to vector<32xf32>
    %315 = vector.shape_cast %314 : vector<32xf32> to vector<1x32xf32>
    %316 = arith.addf %287, %315 : vector<1x32xf32>
    %cst_97 = arith.constant 5.000000e-06 : f32
    %317 = vector.broadcast %cst_97 : f32 to vector<1x32xf32>
    %318 = arith.mulf %316, %317 : vector<1x32xf32>
    %cst_98 = arith.constant 9.99999974E-5 : f32
    %319 = vector.broadcast %cst_98 : f32 to vector<1x32xf32>
    %320 = arith.subf %318, %319 : vector<1x32xf32>
    %321 = vector.broadcast %320 : vector<1x32xf32> to vector<2x32xf32>
    %322 = arith.addf %313, %321 : vector<2x32xf32>
    %cst_99 = arith.constant 5.000000e-01 : f32
    %cst_100 = arith.constant 2.000000e+00 : f32
    %323 = vector.broadcast %cst_99 : f32 to vector<2x32xf32>
    %324 = arith.maximumf %323, %322 : vector<2x32xf32>
    %325 = vector.broadcast %cst_100 : f32 to vector<2x32xf32>
    %326 = arith.minimumf %325, %324 : vector<2x32xf32>
    %c2_101 = arith.constant 2 : index
    %c0_102 = arith.constant 0 : index
    %327 = vector.load %arg13[%c2_101, %c0_102] : memref<16x32xf32, #tpu.memory_space<vmem>>, vector<2x32xf32>
    tpu.vector_store %arg13[%c2_101, %c0_102], %305 {strides = array<i32>} : memref<16x32xf32, #tpu.memory_space<vmem>>, vector<2x32xf32>,
    %328 = vector.extract_strided_slice %263 {offsets = [4, 0], sizes = [2, 32], strides = [1, 1]} : vector<16x32xf32> to vector<2x32xf32>
    %329 = vector.broadcast %15 : vector<1x32xf32> to vector<2x32xf32>
    %330 = arith.mulf %308, %329 : vector<2x32xf32>
    %331 = arith.addf %330, %328 : vector<2x32xf32>
    %332 = arith.cmpf oge, %331, %326 : vector<2x32xf32>
    %333 = arith.extui %332 : vector<2x32xi1> to vector<2x32xi32>
    %334 = arith.sitofp %333 : vector<2x32xi32> to vector<2x32xf32>
    %335 = vector.shape_cast %17 : vector<1x32xf32> to vector<1x32xf32>
    %336 = vector.broadcast %335 : vector<1x32xf32> to vector<2x32xf32>
    %337 = arith.select %332, %336, %331 : vector<2x32xi1>, vector<2x32xf32>
    %338 = vector.broadcast %20 : vector<1x32xi1> to vector<2x32xi1>
    %339 = arith.andi %332, %338 : vector<2x32xi1>
    %340 = vector.broadcast %21 : vector<1x32xf32> to vector<2x32xf32>
    %341 = arith.addf %326, %340 : vector<2x32xf32>
    %342 = arith.select %339, %341, %326 : vector<2x32xi1>, vector<2x32xf32>
    %cst_103 = arith.constant dense<0.000000e+00> : vector<32xf32>
    %343 = vector.multi_reduction <add>, %334, %cst_103 [0] : vector<2x32xf32> to vector<32xf32>
    %344 = vector.shape_cast %343 : vector<32xf32> to vector<1x32xf32>
    %345 = arith.addf %316, %344 : vector<1x32xf32>
    %cst_104 = arith.constant 5.000000e-06 : f32
    %346 = vector.broadcast %cst_104 : f32 to vector<1x32xf32>
    %347 = arith.mulf %345, %346 : vector<1x32xf32>
    %cst_105 = arith.constant 9.99999974E-5 : f32
    %348 = vector.broadcast %cst_105 : f32 to vector<1x32xf32>
    %349 = arith.subf %347, %348 : vector<1x32xf32>
    %350 = vector.broadcast %349 : vector<1x32xf32> to vector<2x32xf32>
    %351 = arith.addf %342, %350 : vector<2x32xf32>
    %cst_106 = arith.constant 5.000000e-01 : f32
    %cst_107 = arith.constant 2.000000e+00 : f32
    %352 = vector.broadcast %cst_106 : f32 to vector<2x32xf32>
    %353 = arith.maximumf %352, %351 : vector<2x32xf32>
    %354 = vector.broadcast %cst_107 : f32 to vector<2x32xf32>
    %355 = arith.minimumf %354, %353 : vector<2x32xf32>
    %c4_108 = arith.constant 4 : index
    %c0_109 = arith.constant 0 : index
    %356 = vector.load %arg13[%c4_108, %c0_109] : memref<16x32xf32, #tpu.memory_space<vmem>>, vector<2x32xf32>
    tpu.vector_store %arg13[%c4_108, %c0_109], %334 {strides = array<i32>} : memref<16x32xf32, #tpu.memory_space<vmem>>, vector<2x32xf32>,
    %357 = vector.extract_strided_slice %263 {offsets = [6, 0], sizes = [2, 32], strides = [1, 1]} : vector<16x32xf32> to vector<2x32xf32>
    %358 = vector.broadcast %15 : vector<1x32xf32> to vector<2x32xf32>
    %359 = arith.mulf %337, %358 : vector<2x32xf32>
    %360 = arith.addf %359, %357 : vector<2x32xf32>
    %361 = arith.cmpf oge, %360, %355 : vector<2x32xf32>
    %362 = arith.extui %361 : vector<2x32xi1> to vector<2x32xi32>
    %363 = arith.sitofp %362 : vector<2x32xi32> to vector<2x32xf32>
    %364 = vector.shape_cast %17 : vector<1x32xf32> to vector<1x32xf32>
    %365 = vector.broadcast %364 : vector<1x32xf32> to vector<2x32xf32>
    %366 = arith.select %361, %365, %360 : vector<2x32xi1>, vector<2x32xf32>
    %367 = vector.broadcast %20 : vector<1x32xi1> to vector<2x32xi1>
    %368 = arith.andi %361, %367 : vector<2x32xi1>
    %369 = vector.broadcast %21 : vector<1x32xf32> to vector<2x32xf32>
    %370 = arith.addf %355, %369 : vector<2x32xf32>
    %371 = arith.select %368, %370, %355 : vector<2x32xi1>, vector<2x32xf32>
    %cst_110 = arith.constant dense<0.000000e+00> : vector<32xf32>
    %372 = vector.multi_reduction <add>, %363, %cst_110 [0] : vector<2x32xf32> to vector<32xf32>
    %373 = vector.shape_cast %372 : vector<32xf32> to vector<1x32xf32>
    %374 = arith.addf %345, %373 : vector<1x32xf32>
    %cst_111 = arith.constant 5.000000e-06 : f32
    %375 = vector.broadcast %cst_111 : f32 to vector<1x32xf32>
    %376 = arith.mulf %374, %375 : vector<1x32xf32>
    %cst_112 = arith.constant 9.99999974E-5 : f32
    %377 = vector.broadcast %cst_112 : f32 to vector<1x32xf32>
    %378 = arith.subf %376, %377 : vector<1x32xf32>
    %379 = vector.broadcast %378 : vector<1x32xf32> to vector<2x32xf32>
    %380 = arith.addf %371, %379 : vector<2x32xf32>
    %cst_113 = arith.constant 5.000000e-01 : f32
    %cst_114 = arith.constant 2.000000e+00 : f32
    %381 = vector.broadcast %cst_113 : f32 to vector<2x32xf32>
    %382 = arith.maximumf %381, %380 : vector<2x32xf32>
    %383 = vector.broadcast %cst_114 : f32 to vector<2x32xf32>
    %384 = arith.minimumf %383, %382 : vector<2x32xf32>
    %c6_115 = arith.constant 6 : index
    %c0_116 = arith.constant 0 : index
    %385 = vector.load %arg13[%c6_115, %c0_116] : memref<16x32xf32, #tpu.memory_space<vmem>>, vector<2x32xf32>
    tpu.vector_store %arg13[%c6_115, %c0_116], %363 {strides = array<i32>} : memref<16x32xf32, #tpu.memory_space<vmem>>, vector<2x32xf32>,
    %386 = vector.extract_strided_slice %263 {offsets = [8, 0], sizes = [2, 32], strides = [1, 1]} : vector<16x32xf32> to vector<2x32xf32>
    %387 = vector.broadcast %15 : vector<1x32xf32> to vector<2x32xf32>
    %388 = arith.mulf %366, %387 : vector<2x32xf32>
    %389 = arith.addf %388, %386 : vector<2x32xf32>
    %390 = arith.cmpf oge, %389, %384 : vector<2x32xf32>
    %391 = arith.extui %390 : vector<2x32xi1> to vector<2x32xi32>
    %392 = arith.sitofp %391 : vector<2x32xi32> to vector<2x32xf32>
    %393 = vector.shape_cast %17 : vector<1x32xf32> to vector<1x32xf32>
    %394 = vector.broadcast %393 : vector<1x32xf32> to vector<2x32xf32>
    %395 = arith.select %390, %394, %389 : vector<2x32xi1>, vector<2x32xf32>
    %396 = vector.broadcast %20 : vector<1x32xi1> to vector<2x32xi1>
    %397 = arith.andi %390, %396 : vector<2x32xi1>
    %398 = vector.broadcast %21 : vector<1x32xf32> to vector<2x32xf32>
    %399 = arith.addf %384, %398 : vector<2x32xf32>
    %400 = arith.select %397, %399, %384 : vector<2x32xi1>, vector<2x32xf32>
    %cst_117 = arith.constant dense<0.000000e+00> : vector<32xf32>
    %401 = vector.multi_reduction <add>, %392, %cst_117 [0] : vector<2x32xf32> to vector<32xf32>
    %402 = vector.shape_cast %401 : vector<32xf32> to vector<1x32xf32>
    %403 = arith.addf %374, %402 : vector<1x32xf32>
    %cst_118 = arith.constant 5.000000e-06 : f32
    %404 = vector.broadcast %cst_118 : f32 to vector<1x32xf32>
    %405 = arith.mulf %403, %404 : vector<1x32xf32>
    %cst_119 = arith.constant 9.99999974E-5 : f32
    %406 = vector.broadcast %cst_119 : f32 to vector<1x32xf32>
    %407 = arith.subf %405, %406 : vector<1x32xf32>
    %408 = vector.broadcast %407 : vector<1x32xf32> to vector<2x32xf32>
    %409 = arith.addf %400, %408 : vector<2x32xf32>
    %cst_120 = arith.constant 5.000000e-01 : f32
    %cst_121 = arith.constant 2.000000e+00 : f32
    %410 = vector.broadcast %cst_120 : f32 to vector<2x32xf32>
    %411 = arith.maximumf %410, %409 : vector<2x32xf32>
    %412 = vector.broadcast %cst_121 : f32 to vector<2x32xf32>
    %413 = arith.minimumf %412, %411 : vector<2x32xf32>
    %c8_122 = arith.constant 8 : index
    %c0_123 = arith.constant 0 : index
    %414 = vector.load %arg13[%c8_122, %c0_123] : memref<16x32xf32, #tpu.memory_space<vmem>>, vector<2x32xf32>
    tpu.vector_store %arg13[%c8_122, %c0_123], %392 {strides = array<i32>} : memref<16x32xf32, #tpu.memory_space<vmem>>, vector<2x32xf32>,
    %415 = vector.extract_strided_slice %263 {offsets = [10, 0], sizes = [2, 32], strides = [1, 1]} : vector<16x32xf32> to vector<2x32xf32>
    %416 = vector.broadcast %15 : vector<1x32xf32> to vector<2x32xf32>
    %417 = arith.mulf %395, %416 : vector<2x32xf32>
    %418 = arith.addf %417, %415 : vector<2x32xf32>
    %419 = arith.cmpf oge, %418, %413 : vector<2x32xf32>
    %420 = arith.extui %419 : vector<2x32xi1> to vector<2x32xi32>
    %421 = arith.sitofp %420 : vector<2x32xi32> to vector<2x32xf32>
    %422 = vector.shape_cast %17 : vector<1x32xf32> to vector<1x32xf32>
    %423 = vector.broadcast %422 : vector<1x32xf32> to vector<2x32xf32>
    %424 = arith.select %419, %423, %418 : vector<2x32xi1>, vector<2x32xf32>
    %425 = vector.broadcast %20 : vector<1x32xi1> to vector<2x32xi1>
    %426 = arith.andi %419, %425 : vector<2x32xi1>
    %427 = vector.broadcast %21 : vector<1x32xf32> to vector<2x32xf32>
    %428 = arith.addf %413, %427 : vector<2x32xf32>
    %429 = arith.select %426, %428, %413 : vector<2x32xi1>, vector<2x32xf32>
    %cst_124 = arith.constant dense<0.000000e+00> : vector<32xf32>
    %430 = vector.multi_reduction <add>, %421, %cst_124 [0] : vector<2x32xf32> to vector<32xf32>
    %431 = vector.shape_cast %430 : vector<32xf32> to vector<1x32xf32>
    %432 = arith.addf %403, %431 : vector<1x32xf32>
    %cst_125 = arith.constant 5.000000e-06 : f32
    %433 = vector.broadcast %cst_125 : f32 to vector<1x32xf32>
    %434 = arith.mulf %432, %433 : vector<1x32xf32>
    %cst_126 = arith.constant 9.99999974E-5 : f32
    %435 = vector.broadcast %cst_126 : f32 to vector<1x32xf32>
    %436 = arith.subf %434, %435 : vector<1x32xf32>
    %437 = vector.broadcast %436 : vector<1x32xf32> to vector<2x32xf32>
    %438 = arith.addf %429, %437 : vector<2x32xf32>
    %cst_127 = arith.constant 5.000000e-01 : f32
    %cst_128 = arith.constant 2.000000e+00 : f32
    %439 = vector.broadcast %cst_127 : f32 to vector<2x32xf32>
    %440 = arith.maximumf %439, %438 : vector<2x32xf32>
    %441 = vector.broadcast %cst_128 : f32 to vector<2x32xf32>
    %442 = arith.minimumf %441, %440 : vector<2x32xf32>
    %c10_129 = arith.constant 10 : index
    %c0_130 = arith.constant 0 : index
    %443 = vector.load %arg13[%c10_129, %c0_130] : memref<16x32xf32, #tpu.memory_space<vmem>>, vector<2x32xf32>
    tpu.vector_store %arg13[%c10_129, %c0_130], %421 {strides = array<i32>} : memref<16x32xf32, #tpu.memory_space<vmem>>, vector<2x32xf32>,
    %444 = vector.extract_strided_slice %263 {offsets = [12, 0], sizes = [2, 32], strides = [1, 1]} : vector<16x32xf32> to vector<2x32xf32>
    %445 = vector.broadcast %15 : vector<1x32xf32> to vector<2x32xf32>
    %446 = arith.mulf %424, %445 : vector<2x32xf32>
    %447 = arith.addf %446, %444 : vector<2x32xf32>
    %448 = arith.cmpf oge, %447, %442 : vector<2x32xf32>
    %449 = arith.extui %448 : vector<2x32xi1> to vector<2x32xi32>
    %450 = arith.sitofp %449 : vector<2x32xi32> to vector<2x32xf32>
    %451 = vector.shape_cast %17 : vector<1x32xf32> to vector<1x32xf32>
    %452 = vector.broadcast %451 : vector<1x32xf32> to vector<2x32xf32>
    %453 = arith.select %448, %452, %447 : vector<2x32xi1>, vector<2x32xf32>
    %454 = vector.broadcast %20 : vector<1x32xi1> to vector<2x32xi1>
    %455 = arith.andi %448, %454 : vector<2x32xi1>
    %456 = vector.broadcast %21 : vector<1x32xf32> to vector<2x32xf32>
    %457 = arith.addf %442, %456 : vector<2x32xf32>
    %458 = arith.select %455, %457, %442 : vector<2x32xi1>, vector<2x32xf32>
    %cst_131 = arith.constant dense<0.000000e+00> : vector<32xf32>
    %459 = vector.multi_reduction <add>, %450, %cst_131 [0] : vector<2x32xf32> to vector<32xf32>
    %460 = vector.shape_cast %459 : vector<32xf32> to vector<1x32xf32>
    %461 = arith.addf %432, %460 : vector<1x32xf32>
    %cst_132 = arith.constant 5.000000e-06 : f32
    %462 = vector.broadcast %cst_132 : f32 to vector<1x32xf32>
    %463 = arith.mulf %461, %462 : vector<1x32xf32>
    %cst_133 = arith.constant 9.99999974E-5 : f32
    %464 = vector.broadcast %cst_133 : f32 to vector<1x32xf32>
    %465 = arith.subf %463, %464 : vector<1x32xf32>
    %466 = vector.broadcast %465 : vector<1x32xf32> to vector<2x32xf32>
    %467 = arith.addf %458, %466 : vector<2x32xf32>
    %cst_134 = arith.constant 5.000000e-01 : f32
    %cst_135 = arith.constant 2.000000e+00 : f32
    %468 = vector.broadcast %cst_134 : f32 to vector<2x32xf32>
    %469 = arith.maximumf %468, %467 : vector<2x32xf32>
    %470 = vector.broadcast %cst_135 : f32 to vector<2x32xf32>
    %471 = arith.minimumf %470, %469 : vector<2x32xf32>
    %c12_136 = arith.constant 12 : index
    %c0_137 = arith.constant 0 : index
    %472 = vector.load %arg13[%c12_136, %c0_137] : memref<16x32xf32, #tpu.memory_space<vmem>>, vector<2x32xf32>
    tpu.vector_store %arg13[%c12_136, %c0_137], %450 {strides = array<i32>} : memref<16x32xf32, #tpu.memory_space<vmem>>, vector<2x32xf32>,
    %473 = vector.extract_strided_slice %263 {offsets = [14, 0], sizes = [2, 32], strides = [1, 1]} : vector<16x32xf32> to vector<2x32xf32>
    %474 = vector.broadcast %15 : vector<1x32xf32> to vector<2x32xf32>
    %475 = arith.mulf %453, %474 : vector<2x32xf32>
    %476 = arith.addf %475, %473 : vector<2x32xf32>
    %477 = arith.cmpf oge, %476, %471 : vector<2x32xf32>
    %478 = arith.extui %477 : vector<2x32xi1> to vector<2x32xi32>
    %479 = arith.sitofp %478 : vector<2x32xi32> to vector<2x32xf32>
    %c14_138 = arith.constant 14 : index
    %c0_139 = arith.constant 0 : index
    %480 = vector.load %arg13[%c14_138, %c0_139] : memref<16x32xf32, #tpu.memory_space<vmem>>, vector<2x32xf32>
    tpu.vector_store %arg13[%c14_138, %c0_139], %479 {strides = array<i32>} : memref<16x32xf32, #tpu.memory_space<vmem>>, vector<2x32xf32>,
    %c0_140 = arith.constant 0 : index
    %c0_141 = arith.constant 0 : index
    %481 = vector.load %arg13[%c0_140, %c0_141] : memref<16x32xf32, #tpu.memory_space<vmem>>, vector<16x32xf32>
    %c0_142 = arith.constant 0 : index
    %c0_143 = arith.constant 0 : index
    %482 = vector.load %arg9[%c0_142, %c0_143] : memref<32x2xf32, #tpu.memory_space<vmem>>, vector<32x2xf32>
    %cst_144 = arith.constant dense<0.000000e+00> : vector<16x2xf32>
    %483 = tpu.matmul %481, %482, %cst_144 {dimension_numbers = #tpu.dot_dimension_numbers<[1], [0], [0], [1], [0, 0, 1, 1], [], []>, precision = #tpu.contract_precision<fp32>} : vector<16x32xf32>, vector<32x2xf32>, vector<16x2xf32> -> vector<16x2xf32>
    %c0_145 = arith.constant 0 : index
    %c0_146 = arith.constant 0 : index
    %484 = vector.load %arg10[%c0_145, %c0_146] : memref<1x2xf32, #tpu.memory_space<vmem>>, vector<1x2xf32>
    %485 = vector.broadcast %484 : vector<1x2xf32> to vector<16x2xf32>
    %486 = arith.addf %483, %485 : vector<16x2xf32>
    %cst_147 = arith.constant 0.000000e+00 : f32
    %487 = vector.broadcast %cst_147 : f32 to vector<2x2xf32>
    %cst_148 = arith.constant 0.000000e+00 : f32
    %488 = vector.broadcast %cst_148 : f32 to vector<2x2xf32>
    %489 = vector.extract_strided_slice %486 {offsets = [0, 0], sizes = [2, 2], strides = [1, 1]} : vector<16x2xf32> to vector<2x2xf32>
    %490 = arith.subf %489, %487 : vector<2x2xf32>
    %cst_149 = arith.constant 1.000000e-01 : f32
    %491 = vector.broadcast %cst_149 : f32 to vector<2x2xf32>
    %492 = arith.mulf %490, %491 : vector<2x2xf32>
    %493 = arith.addf %487, %492 : vector<2x2xf32>
    %cst_150 = arith.constant 1.000000e+00 : f32
    %494 = vector.broadcast %cst_150 : f32 to vector<2x2xf32>
    %495 = arith.cmpf oge, %493, %494 : vector<2x2xf32>
    %496 = arith.extui %495 : vector<2x2xi1> to vector<2x2xi32>
    %497 = arith.sitofp %496 : vector<2x2xi32> to vector<2x2xf32>
    %498 = arith.addf %488, %497 : vector<2x2xf32>
    %cst_151 = arith.constant 0.000000e+00 : f32
    %499 = vector.broadcast %cst_151 : f32 to vector<2x2xf32>
    %500 = arith.select %495, %499, %493 : vector<2x2xi1>, vector<2x2xf32>
    %501 = vector.extract_strided_slice %486 {offsets = [2, 0], sizes = [2, 2], strides = [1, 1]} : vector<16x2xf32> to vector<2x2xf32>
    %502 = arith.subf %501, %500 : vector<2x2xf32>
    %cst_152 = arith.constant 1.000000e-01 : f32
    %503 = vector.broadcast %cst_152 : f32 to vector<2x2xf32>
    %504 = arith.mulf %502, %503 : vector<2x2xf32>
    %505 = arith.addf %500, %504 : vector<2x2xf32>
    %cst_153 = arith.constant 1.000000e+00 : f32
    %506 = vector.broadcast %cst_153 : f32 to vector<2x2xf32>
    %507 = arith.cmpf oge, %505, %506 : vector<2x2xf32>
    %508 = arith.extui %507 : vector<2x2xi1> to vector<2x2xi32>
    %509 = arith.sitofp %508 : vector<2x2xi32> to vector<2x2xf32>
    %510 = arith.addf %498, %509 : vector<2x2xf32>
    %cst_154 = arith.constant 0.000000e+00 : f32
    %511 = vector.broadcast %cst_154 : f32 to vector<2x2xf32>
    %512 = arith.select %507, %511, %505 : vector<2x2xi1>, vector<2x2xf32>
    %513 = vector.extract_strided_slice %486 {offsets = [4, 0], sizes = [2, 2], strides = [1, 1]} : vector<16x2xf32> to vector<2x2xf32>
    %514 = arith.subf %513, %512 : vector<2x2xf32>
    %cst_155 = arith.constant 1.000000e-01 : f32
    %515 = vector.broadcast %cst_155 : f32 to vector<2x2xf32>
    %516 = arith.mulf %514, %515 : vector<2x2xf32>
    %517 = arith.addf %512, %516 : vector<2x2xf32>
    %cst_156 = arith.constant 1.000000e+00 : f32
    %518 = vector.broadcast %cst_156 : f32 to vector<2x2xf32>
    %519 = arith.cmpf oge, %517, %518 : vector<2x2xf32>
    %520 = arith.extui %519 : vector<2x2xi1> to vector<2x2xi32>
    %521 = arith.sitofp %520 : vector<2x2xi32> to vector<2x2xf32>
    %522 = arith.addf %510, %521 : vector<2x2xf32>
    %cst_157 = arith.constant 0.000000e+00 : f32
    %523 = vector.broadcast %cst_157 : f32 to vector<2x2xf32>
    %524 = arith.select %519, %523, %517 : vector<2x2xi1>, vector<2x2xf32>
    %525 = vector.extract_strided_slice %486 {offsets = [6, 0], sizes = [2, 2], strides = [1, 1]} : vector<16x2xf32> to vector<2x2xf32>
    %526 = arith.subf %525, %524 : vector<2x2xf32>
    %cst_158 = arith.constant 1.000000e-01 : f32
    %527 = vector.broadcast %cst_158 : f32 to vector<2x2xf32>
    %528 = arith.mulf %526, %527 : vector<2x2xf32>
    %529 = arith.addf %524, %528 : vector<2x2xf32>
    %cst_159 = arith.constant 1.000000e+00 : f32
    %530 = vector.broadcast %cst_159 : f32 to vector<2x2xf32>
    %531 = arith.cmpf oge, %529, %530 : vector<2x2xf32>
    %532 = arith.extui %531 : vector<2x2xi1> to vector<2x2xi32>
    %533 = arith.sitofp %532 : vector<2x2xi32> to vector<2x2xf32>
    %534 = arith.addf %522, %533 : vector<2x2xf32>
    %cst_160 = arith.constant 0.000000e+00 : f32
    %535 = vector.broadcast %cst_160 : f32 to vector<2x2xf32>
    %536 = arith.select %531, %535, %529 : vector<2x2xi1>, vector<2x2xf32>
    %537 = vector.extract_strided_slice %486 {offsets = [8, 0], sizes = [2, 2], strides = [1, 1]} : vector<16x2xf32> to vector<2x2xf32>
    %538 = arith.subf %537, %536 : vector<2x2xf32>
    %cst_161 = arith.constant 1.000000e-01 : f32
    %539 = vector.broadcast %cst_161 : f32 to vector<2x2xf32>
    %540 = arith.mulf %538, %539 : vector<2x2xf32>
    %541 = arith.addf %536, %540 : vector<2x2xf32>
    %cst_162 = arith.constant 1.000000e+00 : f32
    %542 = vector.broadcast %cst_162 : f32 to vector<2x2xf32>
    %543 = arith.cmpf oge, %541, %542 : vector<2x2xf32>
    %544 = arith.extui %543 : vector<2x2xi1> to vector<2x2xi32>
    %545 = arith.sitofp %544 : vector<2x2xi32> to vector<2x2xf32>
    %546 = arith.addf %534, %545 : vector<2x2xf32>
    %cst_163 = arith.constant 0.000000e+00 : f32
    %547 = vector.broadcast %cst_163 : f32 to vector<2x2xf32>
    %548 = arith.select %543, %547, %541 : vector<2x2xi1>, vector<2x2xf32>
    %549 = vector.extract_strided_slice %486 {offsets = [10, 0], sizes = [2, 2], strides = [1, 1]} : vector<16x2xf32> to vector<2x2xf32>
    %550 = arith.subf %549, %548 : vector<2x2xf32>
    %cst_164 = arith.constant 1.000000e-01 : f32
    %551 = vector.broadcast %cst_164 : f32 to vector<2x2xf32>
    %552 = arith.mulf %550, %551 : vector<2x2xf32>
    %553 = arith.addf %548, %552 : vector<2x2xf32>
    %cst_165 = arith.constant 1.000000e+00 : f32
    %554 = vector.broadcast %cst_165 : f32 to vector<2x2xf32>
    %555 = arith.cmpf oge, %553, %554 : vector<2x2xf32>
    %556 = arith.extui %555 : vector<2x2xi1> to vector<2x2xi32>
    %557 = arith.sitofp %556 : vector<2x2xi32> to vector<2x2xf32>
    %558 = arith.addf %546, %557 : vector<2x2xf32>
    %cst_166 = arith.constant 0.000000e+00 : f32
    %559 = vector.broadcast %cst_166 : f32 to vector<2x2xf32>
    %560 = arith.select %555, %559, %553 : vector<2x2xi1>, vector<2x2xf32>
    %561 = vector.extract_strided_slice %486 {offsets = [12, 0], sizes = [2, 2], strides = [1, 1]} : vector<16x2xf32> to vector<2x2xf32>
    %562 = arith.subf %561, %560 : vector<2x2xf32>
    %cst_167 = arith.constant 1.000000e-01 : f32
    %563 = vector.broadcast %cst_167 : f32 to vector<2x2xf32>
    %564 = arith.mulf %562, %563 : vector<2x2xf32>
    %565 = arith.addf %560, %564 : vector<2x2xf32>
    %cst_168 = arith.constant 1.000000e+00 : f32
    %566 = vector.broadcast %cst_168 : f32 to vector<2x2xf32>
    %567 = arith.cmpf oge, %565, %566 : vector<2x2xf32>
    %568 = arith.extui %567 : vector<2x2xi1> to vector<2x2xi32>
    %569 = arith.sitofp %568 : vector<2x2xi32> to vector<2x2xf32>
    %570 = arith.addf %558, %569 : vector<2x2xf32>
    %cst_169 = arith.constant 0.000000e+00 : f32
    %571 = vector.broadcast %cst_169 : f32 to vector<2x2xf32>
    %572 = arith.select %567, %571, %565 : vector<2x2xi1>, vector<2x2xf32>
    %573 = vector.extract_strided_slice %486 {offsets = [14, 0], sizes = [2, 2], strides = [1, 1]} : vector<16x2xf32> to vector<2x2xf32>
    %574 = arith.subf %573, %572 : vector<2x2xf32>
    %cst_170 = arith.constant 1.000000e-01 : f32
    %575 = vector.broadcast %cst_170 : f32 to vector<2x2xf32>
    %576 = arith.mulf %574, %575 : vector<2x2xf32>
    %577 = arith.addf %572, %576 : vector<2x2xf32>
    %cst_171 = arith.constant 1.000000e+00 : f32
    %578 = vector.broadcast %cst_171 : f32 to vector<2x2xf32>
    %579 = arith.cmpf oge, %577, %578 : vector<2x2xf32>
    %580 = arith.extui %579 : vector<2x2xi1> to vector<2x2xi32>
    %581 = arith.sitofp %580 : vector<2x2xi32> to vector<2x2xf32>
    %582 = arith.addf %570, %581 : vector<2x2xf32>
    %c0_172 = arith.constant 0 : index
    %c0_173 = arith.constant 0 : index
    %583 = vector.load %arg11[%c0_172, %c0_173] : memref<2x2xf32, #tpu.memory_space<vmem>>, vector<2x2xf32>
    tpu.vector_store %arg11[%c0_172, %c0_173], %582 {strides = array<i32>} : memref<2x2xf32, #tpu.memory_space<vmem>>, vector<2x2xf32>,
    return
  }
}

</mosaic_0001>

<bundles_post_ra>
// kernel: innovative_soma_net.1
= control target key start
LH: loop header
LB: loop body
LE: loop exit
PB: predicated region body
PF: predicated region fallthrough
CT: control target
= control target key end

     0   :  { %v1230_v1 = vmov 0   ;;  %s1758_s0 = inlined_call_operand.vmem [shape: f32[16,2], index: 0, kind: input, shape index: {}]   ;;  %s1759_s1 = inlined_call_operand.vmem [shape: f32[16,64], index: 1, kind: input, shape index: {}]   ;;  %s1760_s2 = inlined_call_operand.vmem [shape: f32[16,32], index: 2, kind: input, shape index: {}]   ;;  %s1761_s3 = inlined_call_operand.vmem [shape: f32[2,64], index: 3, kind: input, shape index: {}]   ;;  %s1762_s4 = inlined_call_operand.vmem [shape: f32[1,64], index: 4, kind: input, shape index: {}]   ;;  %s1763_s5 = inlined_call_operand.vmem [shape: f32[5,64], index: 5, kind: input, shape index: {}]   ;;  %s1764_s6 = inlined_call_operand.vmem [shape: f32[64,32], index: 6, kind: input, shape index: {}]   ;;  %s1765_s7 = inlined_call_operand.vmem [shape: f32[1,32], index: 7, kind: input, shape index: {}]   ;;  %s1766_s8 = inlined_call_operand.vmem [shape: f32[5,32], index: 8, kind: input, shape index: {}]   ;;  %s1767_s9 = inlined_call_operand.vmem [shape: f32[32,2], index: 9, kind: input, shape index: {}]   ;;  %s1768_s10 = inlined_call_operand.vmem [shape: f32[1,2], index: 10, kind: input, shape index: {}]   ;;  %s1769_s11 = inlined_call_operand.hbm [shape: f32[2,2], index: 11, kind: output, shape index: {}]  }
   0x1   :  { %v83_v0 = vld [vmem:[%s1758_s0] sm:$0xff]  ;;  %1187 = vset.pattern.permute.xlu0 %v1230_v1  ;;  %1189 = vset.pattern.permute.xlu1 %v1230_v1  ;;  %v84_v2 = vld [vmem:[%s1758_s0 + $0x8] sm:$0xff] }
   0x2   :  { %88 = vperm.xlu0 %1187, %v83_v0   ;;  %93 = vperm.xlu1 %1189, %v84_v2  }
   0x3   :  { %16 = vsyncpa [#allocation5], 0  ;;  %v1231_v3 = vmov 1   ;;  %v39_v4 = vld [vmem:[%s1763_s5] sm:$0x1]  ;;  %vm139_vm4 = vcmask 517120  }
   0x4   :  { %1200 = vrcp.f32 %v39_v4  ;;  %vm45_vm0 = vweird.f32 %v39_v4  ;;  %v51_v9 = vand.u32 2147483648, %v39_v4  ;;  %v49_v11 = vand.u32 2147483647, %v39_v4  ;;  %v1308_v16 = vld [vmem:[%s1761_s3] ss:$0 sm:$0xff]  ;;  %s1136_s14 = sshll.u32 %s1769_s11, 4  ;;  %s1137_s14 = int_to_ptr.hbm [resolvable:$true] %s1136_s14 }
   0x5   :  { %v1313_v17 = vld [vmem:[%s1761_s3 + $0x1] ss:$0 sm:$0xff]  ;;  %v1319_v21 = vld [vmem:[%s1762_s4] ss:$0 sm:$0xff]  ;;  %v58_v31 = vld [vmem:[%s1763_s5 + $0x3] sm:$0x1] }
   0x6   :  { %v52_v12 = vor.u32 1.1754944e-38, %v51_v9  ;;  %vm50_vm3 = vcmp.eq.f32.partialorder %v49_v11, 8.507059e+37  ;;  %v119_v25 = vld [vmem:[%s1759_s1] sm:$0xff]  ;;  %v1232_v32 = vmov 0.0   ;;  %vm59_vm6 = vcmp.gt.f32.partialorder %v58_v31, 0.0 }
   0x7   :  { %v1194_v29 = vld [vmem:[%s1763_s5 + $0x1] ss:$0 sm:$0xff]  ;;  %v132_v36 = vsel %vm59_vm6, 1, %v1230_v1  ;;  %v60_v39 = vld [vmem:[%s1763_s5 + $0x4] sm:$0x1]  ;;  %vm327_vm14 = vcmask 523264  }
   0x8   :  { %v56_v38 = vld [vmem:[%s1763_s5 + $0x1] sm:$0x1]  ;;  %v133_v41 = vperm.slane %v132_v36, 0  ;;  %v1356_v46 = vld [vmem:[%s1763_s5 + $0x2] ss:$0 sm:$0xff] }
   0x9   :  { %v136_v43 = vadd.f32 %v60_v39, %v56_v38 }
   0xa   :  { %1188 = vset.pattern.permute.xlu0 %v1231_v3  ;;  %1190 = vset.pattern.permute.xlu1 %v1231_v3  ;;  %v1201_v5 = vpop.eup %1200  ;;  %vm1349_vm7 = vcmp.eq.s32.totalorder %v133_v41, 1 }
   0xb   :  { %101 = vperm.xlu0 %1188, %v83_v0   ;;  %105 = vperm.xlu1 %1190, %v84_v2   ;;  %v41_v6 = vmul.f32 %v1201_v5, %v39_v4  ;;  %vm46_vm1 = vweird.f32 %v1201_v5  ;;  %v137_v48 = vperm.slane %v136_v43, 0  ;;  %v1369_v0 = vperm.slane %v60_v39, 0  ;;  %v322_v4 = vld [vmem:[%s1764_s6 + $0x38] sm:$0xff] }
   0xc   :  { %vm47_vm2 = vmor %vm45_vm0, %vm46_vm1 }
   0xd   :  { %v42_v7 = vsub.f32 1.0, %v41_v6 }
   0xf   :  { %v43_v8 = vmul.f32 %v1201_v5, %v42_v7  ;;  %v321_v7 = vld [vmem:[%s1764_s6 + $0x30] sm:$0xff] }
  0x10   :  { %v1382_v9 = vand.u32 4294901760, %v321_v7 }
  0x11   :  { %v44_v10 = vadd.f32 %v1201_v5, %v43_v8 }
  0x13   :  { %v48_v14 = vsel %vm47_vm2, %v1201_v5, %v44_v10  ;;  %v1374_v5 = vand.u32 4294901760, %v322_v4 }
  0x14   :  { %v53_v15 = vsel %vm50_vm3, %v52_v12, %v48_v14  ;;  %v320_v12 = vld [vmem:[%s1764_s6 + $0x28] sm:$0xff] }
  0x15   :  { %v55_v18 = vsub.f32 1.0, %v53_v15  ;;  %v1380_v8 = vsub.f32 %v322_v4, %v1374_v5  ;;  %492 = vmatpush.msra.mxu3 %v1374_v5  ;;  %343 = vmatpush.msra.mxu0 %v1374_v5  ;;  %v1399_v15 = vsub.f32 %v321_v7, %v1382_v9 }
  0x17   :  { %v1322_v23 = vperm.slane %v55_v18, 0  ;;  %v385_v14 = vand.u32 4294901760, %v1380_v8  ;;  %450 = vmatpush.msra.mxu2 %v1380_v8  ;;  %v1402_v18 = vand.u32 4294901760, %v320_v12  ;;  %494 = vmatpush.msra.mxu3 %v1382_v9 }
  0x18   :  { %345 = vmatpush.msra.mxu0 %v1382_v9 }
  0x19   :  { %v124_v27 = vmul.f32 0.0, %v1322_v23  ;;  %453 = vmatpush.msra.mxu2 %v1399_v15  ;;  %496 = vmatpush.msra.mxu3 %v1402_v18 }
  0x1a   :  { %347 = vmatpush.msra.mxu0 %v1402_v18 }
  0x74   :  { %v89_v13 = vpop.permute.xlu0 %88  ;;  %v94_v3 = vpop.permute.xlu1 %93 }
  0x75   :  { %v97_v20 = vmul.f32 %v1308_v16, %v89_v13 }
  0x7d   :  { %v102_v19 = vpop.permute.xlu0 %101  ;;  %v106_v31 = vpop.permute.xlu1 %105 }
  0x7e   :  { %v109_v22 = vmul.f32 %v1313_v17, %v102_v19 }
  0x80   :  { %v111_v24 = vadd.f32 %v109_v22, %v97_v20  ;;  %v319_v20 = vld [vmem:[%s1764_s6 + $0x20] sm:$0xff]  ;;  %v386_v22 = vsub.f32 %v1380_v8, %v385_v14 }
  0x82   :  { %v117_v26 = vadd.f32 %v1319_v21, %v111_v24  ;;  %v391_v24 = vand.u32 4294901760, %v1399_v15  ;;  %v387_v36 = vand.u32 4294901760, %v386_v22 }
  0x84   :  { %v1329_v28 = vadd.f32 %v119_v25, %v117_v26  ;;  %v1416_v25 = vsub.f32 %v320_v12, %v1402_v18  ;;  %v1419_v26 = vand.u32 4294901760, %v319_v20  ;;  %388 = vmatpush.msra.mxu1 %v387_v36 }
  0x86   :  { %v125_v30 = vadd.f32 %v124_v27, %v1329_v28  ;;  %v156_v56 = vrot.slane %v1329_v28, 2  ;;  %456 = vmatpush.msra.mxu2 %v1416_v25  ;;  %498 = vmatpush.msra.mxu3 %v1419_v26  ;;  %v397_v39 = vand.u32 4294901760, %v1416_v25 }
  0x87   :  { %349 = vmatpush.msra.mxu0 %v1419_v26 }
  0x88   :  { %vm127_vm5 = vcmp.ge.f32.partialorder %v125_v30, %v1194_v29 }
  0x89   :  { %v1145_v33 = vsel %vm127_vm5, 1.0, %v1232_v32  ;;  %vm135_vm8 = vmand %vm127_vm5, %vm1349_vm7  ;;  %v131_v50 = vsel %vm127_vm5, %v1356_v46, %v125_v30 }
  0x8a   :  { %v140_v34 = vsel %vm139_vm4, %v1145_v33, 0.0  ;;  %153 = vst.msk [vmem:[#allocation2] sm:$0x3] %vm139_vm4, %v1145_v33  ;;  %v138_v52 = vsel %vm135_vm8, %v137_v48, %v1194_v29  ;;  %v154_v54 = vmul.f32 %v131_v50, %v1322_v23  ;;  %v318_v33 = vld [vmem:[%s1764_s6 + $0x18] sm:$0xff]  ;;  %v398_v48 = vsub.f32 %v1416_v25, %v397_v39 }
  0x8b   :  { %v141_v35 = vrot.slane %v140_v34, 4  ;;  %v1442_v41 = vand.u32 4294901760, %v318_v33 }
  0x8c   :  { %v158_v58 = vadd.f32 %v156_v56, %v154_v54 }
  0x8d   :  { %v142_v37 = vadd.f32 %v141_v35, %v140_v34  ;;  %v98_v34 = vmul.f32 %v1308_v16, %v94_v3  ;;  %v110_v35 = vmul.f32 %v1313_v17, %v106_v31  ;;  %v317_v16 = vld [vmem:[%s1764_s6 + $0x10] sm:$0xff]  ;;  %v1456_v50 = vsub.f32 %v318_v33, %v1442_v41  ;;  %500 = vmatpush.msra.mxu3 %v1442_v41 }
  0x8e   :  { %351 = vmatpush.msra.mxu0 %v1442_v41 }
  0x8f   :  { %v143_v40 = vrot.slane %v142_v37, 2 }
  0x91   :  { %v144_v42 = vadd.f32 %v143_v40, %v142_v37  ;;  %v392_v37 = vsub.f32 %v1399_v15, %v391_v24  ;;  %v1440_v40 = vsub.f32 %v319_v20, %v1419_v26 }
  0x93   :  { %v145_v44 = vrot.slane %v144_v42, 1  ;;  %v393_v43 = vand.u32 4294901760, %v392_v37  ;;  %459 = vmatpush.msra.mxu2 %v1440_v40 }
  0x95   :  { %v146_v47 = vadd.f32 %v145_v44, %v144_v42  ;;  %v112_v42 = vadd.f32 %v110_v35, %v98_v34  ;;  %v1449_v44 = vand.u32 4294901760, %v317_v16  ;;  %394 = vmatpush.msra.mxu1 %v393_v43  ;;  %462 = vmatpush.msra.mxu2 %v1456_v50 }
  0x97   :  { %v148_v49 = vmul.f32 5e-06, %v146_v47  ;;  %v414_v54 = vsub.f32 %v317_v16, %v1449_v44  ;;  %502 = vmatpush.msra.mxu3 %v1449_v44  ;;  %353 = vmatpush.msra.mxu0 %v1449_v44 }
  0x99   :  { %v1146_v51 = vadd.f32 -0.0001, %v148_v49  ;;  %v403_v49 = vand.u32 4294901760, %v1440_v40  ;;  %465 = vmatpush.msra.mxu2 %v414_v54 }
  0x9b   :  { %v150_v53 = vadd.f32 %v1146_v51, %v138_v52  ;;  %v316_v51 = vld [vmem:[%s1764_s6 + $0x8] sm:$0xff]  ;;  %v182_v52 = vrot.slane %v1329_v28, 4 }
  0x9d   :  { %v151_v55 = vmax.f32 %v150_v53, 0.5  ;;  %v1465_v53 = vadd.f32 %v1319_v21, %v112_v42  ;;  %v315_v21 = vld [vmem:[%s1764_s6] sm:$0xff] }
  0x9f   :  { %v152_v57 = vmin.f32 %v151_v55, 2.0  ;;  %v1468_v55 = vand.u32 4294901760, %v316_v51 }
  0xa1   :  { %vm159_vm9 = vcmp.ge.f32.partialorder %v158_v58, %v152_v57  ;;  %v165_v10 = vadd.f32 %v1369_v0, %v152_v57  ;;  %504 = vmatpush.msra.mxu3 %v1468_v55  ;;  %355 = vmatpush.msra.mxu0 %v1468_v55 }
  0xa2   :  { %v1147_v59 = vsel %vm159_vm9, 1.0, %v1232_v32  ;;  %vm1393_vm10 = vmand %vm159_vm9, %vm1349_vm7  ;;  %v162_v27 = vsel %vm159_vm9, %v1356_v46, %v158_v58  ;;  %v404_v58 = vsub.f32 %v1440_v40, %v403_v49 }
  0xa3   :  { %v167_v60 = vsel %vm139_vm4, %v1147_v59, 0.0  ;;  %180 = vst.msk [vmem:[#allocation2 + $0x2] sm:$0x3] %vm139_vm4, %v1147_v59  ;;  %v166_v29 = vsel %vm1393_vm10, %v165_v10, %v152_v57  ;;  %v181_v17 = vmul.f32 %v162_v27, %v1322_v23  ;;  %v399_v57 = vand.u32 4294901760, %v398_v48 }
  0xa4   :  { %v168_v61 = vrot.slane %v167_v60, 4  ;;  %v409_v59 = vand.u32 4294901760, %v1456_v50  ;;  %v405_v3 = vand.u32 4294901760, %v404_v58 }
  0xa5   :  { %400 = vmatpush.msra.mxu1 %v399_v57 }
  0xa6   :  { %v169_v62 = vadd.f32 %v168_v61, %v167_v60  ;;  %v415_v60 = vand.u32 4294901760, %v414_v54  ;;  %v420_v61 = vsub.f32 %v316_v51, %v1468_v55  ;;  %v410_v4 = vsub.f32 %v1456_v50, %v409_v59 }
  0xa7   :  { %406 = vmatpush.msra.mxu1 %v405_v3 }
  0xa8   :  { %v170_v63 = vrot.slane %v169_v62, 2  ;;  %v421_v7 = vand.u32 4294901760, %v420_v61  ;;  %468 = vmatpush.msra.mxu2 %v420_v61 }
  0xaa   :  { %v171_v2 = vadd.f32 %v170_v63, %v169_v62  ;;  %v1479_v62 = vand.u32 4294901760, %v315_v21  ;;  %v422_v20 = vsub.f32 %v420_v61, %v421_v7 }
  0xac   :  { %v172_v6 = vrot.slane %v171_v2, 1  ;;  %v426_v10 = vsub.f32 %v315_v21, %v1479_v62  ;;  %506 = vmatpush.msra.mxu3 %v1479_v62  ;;  %357 = vmatpush.msra.mxu0 %v1479_v62 }
  0xae   :  { %v173_v11 = vadd.f32 %v172_v6, %v171_v2  ;;  %v184_v2 = vadd.f32 %v182_v52, %v181_v17  ;;  %v416_v6 = vsub.f32 %v414_v54, %v415_v60  ;;  %v427_v27 = vand.u32 4294901760, %v426_v10  ;;  %471 = vmatpush.msra.mxu2 %v426_v10  ;;  %531 = vmatpush.msrb.mxu0 %v385_v14 }
  0xb0   :  { %v1405_v19 = vadd.f32 %v173_v11, %v146_v47  ;;  %v411_v11 = vand.u32 4294901760, %v410_v4  ;;  %v417_v13 = vand.u32 4294901760, %v416_v6  ;;  %v428_v31 = vsub.f32 %v426_v10, %v427_v27  ;;  %535 = vmatpush.msrb.mxu0 %v391_v24 }
  0xb2   :  { %v175_v30 = vmul.f32 5e-06, %v1405_v19  ;;  %412 = vmatpush.msra.mxu1 %v411_v11  ;;  %v429_v34 = vand.u32 4294901760, %v428_v31  ;;  %539 = vmatpush.msrb.mxu0 %v397_v39  ;;  %v120_v39 = vld [vmem:[%s1759_s1 + $0x8] sm:$0xff] }
  0xb3   :  { %v1519_v16 = vadd.f32 %v120_v39, %v1465_v53 }
  0xb4   :  { %v1148_v38 = vadd.f32 -0.0001, %v175_v30  ;;  %v423_v30 = vand.u32 4294901760, %v422_v20  ;;  %418 = vmatpush.msra.mxu1 %v417_v13  ;;  %543 = vmatpush.msrb.mxu0 %v403_v49 }
  0xb5   :  { %v281_v39 = vrot.slane %v1519_v16, 4 }
  0xb6   :  { %v177_v47 = vadd.f32 %v1148_v38, %v166_v29  ;;  %424 = vmatpush.msra.mxu1 %v423_v30  ;;  %547 = vmatpush.msrb.mxu0 %v409_v59  ;;  %v207_v38 = vrot.slane %v1329_v28, 6 }
  0xb8   :  { %v178_v56 = vmax.f32 %v177_v47, 0.5  ;;  %430 = vmatpush.msra.mxu1 %v429_v34  ;;  %551 = vmatpush.msrb.mxu0 %v415_v60 }
  0xba   :  { %v179_v63 = vmin.f32 %v178_v56, 2.0  ;;  %578 = vmatpush.msrb.mxu1 %v1374_v5  ;;  %555 = vmatpush.msrb.mxu0 %v421_v7 }
  0xbc   :  { %vm185_vm11 = vcmp.ge.f32.partialorder %v184_v2, %v179_v63  ;;  %580 = vmatpush.msrb.mxu1 %v1382_v9  ;;  %v190_v15 = vadd.f32 %v179_v63, %v1369_v0  ;;  %559 = vmatpush.msrb.mxu0 %v427_v27 }
  0xbd   :  { %v1149_v12 = vsel %vm185_vm11, 1.0, %v1232_v32  ;;  %vm189_vm12 = vmand %vm185_vm11, %vm1349_vm7  ;;  %v188_v9 = vsel %vm185_vm11, %v1356_v46, %v184_v2  ;;  %vm622_vm11 = vcmask 254976  }
  0xbe   :  { %v192_v22 = vsel %vm139_vm4, %v1149_v12, 0.0  ;;  %205 = vst.msk [vmem:[#allocation2 + $0x4] sm:$0x3] %vm139_vm4, %v1149_v12  ;;  %582 = vmatpush.msrb.mxu1 %v1402_v18  ;;  %v206_v25 = vmul.f32 %v188_v9, %v1322_v23 }
  0xbf   :  { %v193_v29 = vrot.slane %v192_v22, 4 }
  0xc0   :  { %584 = vmatpush.msrb.mxu1 %v1419_v26 }
  0xc1   :  { %v194_v33 = vadd.f32 %v193_v29, %v192_v22  ;;  %v256_v22 = vrot.slane %v1519_v16, 2 }
  0xc2   :  { %586 = vmatpush.msrb.mxu1 %v1442_v41  ;;  %v209_v41 = vadd.f32 %v207_v38, %v206_v25 }
  0xc3   :  { %v195_v35 = vrot.slane %v194_v33, 2 }
  0xc4   :  { %588 = vmatpush.msrb.mxu1 %v1449_v44 }
  0xc5   :  { %v196_v36 = vadd.f32 %v195_v35, %v194_v33 }
  0xc6   :  { %590 = vmatpush.msrb.mxu1 %v1468_v55 }
  0xc7   :  { %v197_v37 = vrot.slane %v196_v36, 1 }
  0xc8   :  { %592 = vmatpush.msrb.mxu1 %v1479_v62 }
  0xc9   :  { %v198_v8 = vadd.f32 %v197_v37, %v196_v36 }
  0xcb   :  { %v199_v14 = vadd.f32 %v198_v8, %v1405_v19  ;;  %v191_v19 = vsel %vm189_vm12, %v190_v15, %v179_v63 }
  0xcd   :  { %v200_v5 = vmul.f32 5e-06, %v199_v14 }
  0xcf   :  { %v1150_v18 = vadd.f32 -0.0001, %v200_v5 }
  0xd1   :  { %v202_v24 = vadd.f32 %v1150_v18, %v191_v19 }
  0xd3   :  { %v203_v26 = vmax.f32 %v202_v24, 0.5 }
  0xd5   :  { %v204_v40 = vmin.f32 %v203_v26, 2.0 }
  0xd7   :  { %vm210_vm13 = vcmp.ge.f32.partialorder %v209_v41, %v204_v40  ;;  %v215_v59 = vadd.f32 %v204_v40, %v1369_v0 }
  0xd8   :  { %v1151_v17 = vsel %vm210_vm13, 1.0, %v1232_v32  ;;  %v213_v42 = vsel %vm210_vm13, %v1356_v46, %v209_v41  ;;  %vm214_vm15 = vmand %vm210_vm13, %vm1349_vm7 }
  0xd9   :  { %v217_v28 = vsel %vm139_vm4, %v1151_v17, 0.0  ;;  %230 = vst.msk [vmem:[#allocation2 + $0x6] sm:$0x3] %vm139_vm4, %v1151_v17  ;;  %v231_v43 = vmul.f32 %v213_v42, %v1322_v23  ;;  %v216_v63 = vsel %vm214_vm15, %v215_v59, %v204_v40 }
  0xda   :  { %v218_v44 = vrot.slane %v217_v28, 4 }
  0xdb   :  { %v232_v47 = vadd.f32 %v231_v43, %v1519_v16 }
  0xdc   :  { %v219_v48 = vadd.f32 %v218_v44, %v217_v28 }
  0xde   :  { %v220_v49 = vrot.slane %v219_v48, 2 }
  0xe0   :  { %v221_v50 = vadd.f32 %v220_v49, %v219_v48  ;;  %v313_v51 = vld [vmem:[#allocation2] sm:$0xff] }
  0xe1   :  { %v329_v52 = vsel %vm327_vm14, %v313_v51, 0 }
  0xe2   :  { %v222_v53 = vrot.slane %v221_v50, 1  ;;  %v1530_v54 = vand.u32 4294901760, %v329_v52 }
  0xe4   :  { %v223_v55 = vadd.f32 %v222_v53, %v221_v50  ;;  %432 = vmatmul.f32.vlgmr.msra.gmra.mxu1 %v1530_v54  ;;  %v359_v56 = vsub.f32 %v329_v52, %v1530_v54 }
  0xe6   :  { %v224_v57 = vadd.f32 %v223_v55, %v199_v14  ;;  %474 = vmatmul.f32.vlgmr.msra.gmra.mxu2 %v359_v56  ;;  %v360_v58 = vand.u32 4294901760, %v359_v56 }
  0xe8   :  { %v225_v21 = vmul.f32 5e-06, %v224_v57  ;;  %510 = vmatmul.f32.vlgmr.msra.gmra.mxu3 %v360_v58  ;;  %v361_v60 = vsub.f32 %v359_v56, %v360_v58 }
  0xea   :  { %v1152_v61 = vadd.f32 -0.0001, %v225_v21  ;;  %v362_v62 = vand.u32 4294901760, %v361_v60 }
  0xec   :  { %v227_v2 = vadd.f32 %v1152_v61, %v216_v63  ;;  %363 = vmatmul.f32.vlgmr.msra.gmra.mxu0 %v362_v62 }
  0xee   :  { %v228_v3 = vmax.f32 %v227_v2, 0.5 }
  0xf0   :  { %v229_v4 = vmin.f32 %v228_v3, 2.0 }
  0xf2   :  { %vm233_vm0 = vcmp.ge.f32.partialorder %v232_v47, %v229_v4  ;;  %v238_v6 = vadd.f32 %v229_v4, %v1369_v0 }
  0xf3   :  { %v1153_v7 = vsel %vm233_vm0, 1.0, %v1232_v32  ;;  %v236_v10 = vsel %vm233_vm0, %v1356_v46, %v232_v47  ;;  %vm1543_vm1 = vmand %vm233_vm0, %vm1349_vm7 }
  0xf4   :  { %v239_v12 = vsel %vm1543_vm1, %v238_v6, %v229_v4  ;;  %v240_v13 = vsel %vm139_vm4, %v1153_v7, 0.0  ;;  %253 = vst.msk [vmem:[#allocation2 + $0x8] sm:$0x3] %vm139_vm4, %v1153_v7  ;;  %v254_v20 = vmul.f32 %v236_v10, %v1322_v23 }
  0xf5   :  { %v241_v27 = vrot.slane %v240_v13, 4 }
  0xf6   :  { %v258_v29 = vadd.f32 %v256_v22, %v254_v20 }
  0xf7   :  { %v242_v30 = vadd.f32 %v241_v27, %v240_v13 }
  0xf9   :  { %v243_v31 = vrot.slane %v242_v30, 2 }
  0xfb   :  { %v244_v33 = vadd.f32 %v243_v31, %v242_v30  ;;  %v61_v30 = vld [vmem:[%s1766_s8] sm:$0x1] }
  0xfc   :  { %1202 = vrcp.f32 %v61_v30 }
  0xfd   :  { %v245_v34 = vrot.slane %v244_v33, 1 }
  0xff   :  { %v246_v35 = vadd.f32 %v245_v34, %v244_v33 }
 0x101   :  { %v247_v36 = vadd.f32 %v246_v35, %v224_v57 }
 0x102   :  { %v1203_v31 = vpop.eup %1202 }
 0x103   :  { %v248_v37 = vmul.f32 5e-06, %v247_v36  ;;  %v63_v33 = vmul.f32 %v1203_v31, %v61_v30  ;;  %vm68_vm8 = vweird.f32 %v1203_v31 }
 0x105   :  { %v1154_v8 = vadd.f32 -0.0001, %v248_v37  ;;  %v64_v34 = vsub.f32 1.0, %v63_v33 }
 0x107   :  { %v250_v14 = vadd.f32 %v1154_v8, %v239_v12  ;;  %v65_v35 = vmul.f32 %v1203_v31, %v64_v34 }
 0x109   :  { %v251_v15 = vmax.f32 %v250_v14, 0.5  ;;  %v66_v14 = vadd.f32 %v1203_v31, %v65_v35 }
 0x10b   :  { %v252_v5 = vmin.f32 %v251_v15, 2.0  ;;  %v71_v15 = vand.u32 2147483647, %v61_v30 }
 0x10d   :  { %vm259_vm2 = vcmp.ge.f32.partialorder %v258_v29, %v252_v5  ;;  %v264_v9 = vadd.f32 %v252_v5, %v1369_v0  ;;  %vm72_vm10 = vcmp.eq.f32.partialorder %v71_v15, 8.507059e+37 }
 0x10e   :  { %v1155_v18 = vsel %vm259_vm2, 1.0, %v1232_v32  ;;  %v262_v19 = vsel %vm259_vm2, %v1356_v46, %v258_v29  ;;  %vm1558_vm3 = vmand %vm259_vm2, %vm1349_vm7 }
 0x10f   :  { %v265_v25 = vsel %vm1558_vm3, %v264_v9, %v252_v5  ;;  %v266_v26 = vsel %vm139_vm4, %v1155_v18, 0.0  ;;  %279 = vst.msk [vmem:[#allocation2 + $0xa] sm:$0x3] %vm139_vm4, %v1155_v18  ;;  %v280_v38 = vmul.f32 %v262_v19, %v1322_v23 }
 0x110   :  { %v267_v40 = vrot.slane %v266_v26, 4 }
 0x111   :  { %v283_v41 = vadd.f32 %v281_v39, %v280_v38 }
 0x112   :  { %v268_v17 = vadd.f32 %v267_v40, %v266_v26 }
 0x114   :  { %v269_v42 = vrot.slane %v268_v17, 2 }
 0x116   :  { %v270_v28 = vadd.f32 %v269_v42, %v268_v17 }
 0x118   :  { %v271_v43 = vrot.slane %v270_v28, 1 }
 0x11a   :  { %v272_v44 = vadd.f32 %v271_v43, %v270_v28 }
 0x11c   :  { %v273_v47 = vadd.f32 %v272_v44, %v247_v36  ;;  %v1196_v36 = vld [vmem:[%s1765_s7] ss:$0 sm:$0xff] }
 0x11e   :  { %v274_v48 = vmul.f32 5e-06, %v273_v47 }
 0x120   :  { %v1156_v49 = vadd.f32 -0.0001, %v274_v48 }
 0x122   :  { %v276_v50 = vadd.f32 %v1156_v49, %v265_v25  ;;  %v602_v49 = vld [vmem:[%s1760_s2] sm:$0xff] }
 0x124   :  { %v277_v51 = vmax.f32 %v276_v50, 0.5 }
 0x126   :  { %v278_v52 = vmin.f32 %v277_v51, 2.0 }
 0x128   :  { %vm284_vm5 = vcmp.ge.f32.partialorder %v283_v41, %v278_v52  ;;  %v289_v53 = vadd.f32 %v278_v52, %v1369_v0  ;;  %v306_v0 = vrot.slane %v1519_v16, 6 }
 0x129   :  { %v1157_v55 = vsel %vm284_vm5, 1.0, %v1232_v32  ;;  %v287_v56 = vsel %vm284_vm5, %v1356_v46, %v283_v41  ;;  %vm1573_vm6 = vmand %vm284_vm5, %vm1349_vm7 }
 0x12a   :  { %v290_v58 = vsel %vm1573_vm6, %v289_v53, %v278_v52  ;;  %v291_v59 = vsel %vm139_vm4, %v1157_v55, 0.0  ;;  %304 = vst.msk [vmem:[#allocation2 + $0xc] sm:$0x3] %vm139_vm4, %v1157_v55  ;;  %v305_v21 = vmul.f32 %v287_v56, %v1322_v23  ;;  %v1197_v53 = vld [vmem:[%s1766_s8 + $0x1] ss:$0 sm:$0xff]  ;;  %vm806_vm6 = vcmask 261120  }
 0x12b   :  { %v292_v60 = vrot.slane %v291_v59, 4  ;;  %v80_v56 = vld [vmem:[%s1766_s8 + $0x3] sm:$0x1] }
 0x12c   :  { %v308_v61 = vadd.f32 %v306_v0, %v305_v21  ;;  %vm81_vm13 = vcmp.gt.f32.partialorder %v80_v56, 0.0 }
 0x12d   :  { %v293_v46 = vadd.f32 %v292_v60, %v291_v59  ;;  %v615_v21 = vsel %vm81_vm13, 1, %v1230_v1  ;;  %v78_v60 = vld [vmem:[%s1766_s8 + $0x1] sm:$0x1]  ;;  %v1629_v1 = vld [vmem:[%s1766_s8 + $0x2] ss:$0 sm:$0xff] }
 0x12f   :  { %v294_v62 = vrot.slane %v293_v46, 2 }
 0x131   :  { %v295_v45 = vadd.f32 %v294_v62, %v293_v46  ;;  %v616_v62 = vperm.slane %v615_v21, 0 }
 0x133   :  { %v296_v63 = vrot.slane %v295_v45, 1 }
 0x135   :  { %v297_v2 = vadd.f32 %v296_v63, %v295_v45 }
 0x137   :  { %v298_v3 = vadd.f32 %v297_v2, %v273_v47 }
 0x139   :  { %v299_v4 = vmul.f32 5e-06, %v298_v3 }
 0x13b   :  { %v1158_v6 = vadd.f32 -0.0001, %v299_v4 }
 0x13d   :  { %v301_v7 = vadd.f32 %v1158_v6, %v290_v58 }
 0x13f   :  { %v302_v10 = vmax.f32 %v301_v7, 0.5 }
 0x141   :  { %v303_v11 = vmin.f32 %v302_v10, 2.0 }
 0x143   :  { %vm309_vm7 = vcmp.ge.f32.partialorder %v308_v61, %v303_v11  ;;  %v82_v61 = vld [vmem:[%s1766_s8 + $0x4] sm:$0x1] }
 0x144   :  { %v1159_v12 = vsel %vm309_vm7, 1.0, %v1232_v32  ;;  %v619_v63 = vadd.f32 %v82_v61, %v78_v60 }
 0x145   :  { %312 = vst.msk [vmem:[#allocation2 + $0xe] sm:$0x3] %vm139_vm4, %v1159_v12  ;;  %vm67_vm4 = vweird.f32 %v61_v30 }
 0x146   :  { %vm69_vm9 = vmor %vm67_vm4, %vm68_vm8  ;;  %v620_v6 = vperm.slane %v619_v63, 0 }
 0x147   :  { %v70_v18 = vsel %vm69_vm9, %v1203_v31, %v66_v14 }
 0x14c   :  { %v314_v23 = vld [vmem:[#allocation2 + $0x8] sm:$0xff] }
 0x14d   :  { %v332_v16 = vsel %vm327_vm14, %v314_v23, 0  ;;  %vm1622_vm14 = vcmp.eq.s32.totalorder %v616_v62, 1 }
 0x14e   :  { %v366_v13 = vand.u32 4294901760, %v332_v16 }
 0x150   :  { %436 = vmatmul.f32.gmra.mxu1 %v366_v13  ;;  %v367_v20 = vsub.f32 %v332_v16, %v366_v13 }
 0x152   :  { %479 = vmatmul.f32.gmra.mxu2 %v367_v20  ;;  %v368_v22 = vand.u32 4294901760, %v367_v20 }
 0x154   :  { %516 = vmatmul.f32.gmra.mxu3 %v368_v22  ;;  %v369_v27 = vsub.f32 %v367_v20, %v368_v22 }
 0x156   :  { %v370_v29 = vand.u32 4294901760, %v369_v27 }
 0x158   :  { %371 = vmatmul.f32.gmra.mxu0 %v370_v29  ;;  %594 = vmatmul.f32.vlgmr.msrb.gmra.mxu1 %v1530_v54 }
 0x160   :  { %561 = vmatmul.f32.vlgmr.msrb.gmra.mxu0 %v1530_v54  ;;  %598 = vmatmul.f32.gmra.mxu1 %v366_v13  ;;  %v73_v54 = vand.u32 2147483648, %v61_v30 }
 0x161   :  { %v433_v37 = vpop.f32.mrf.mxu1 }
 0x162   :  { %v74_v9 = vor.u32 1.1754944e-38, %v73_v54 }
 0x164   :  { %v75_v26 = vsel %vm72_vm10, %v74_v9, %v70_v18  ;;  %v801_v9 = vld [vmem:[%s1767_s9 + $0x18] sm:$0xff] }
 0x165   :  { %v77_v17 = vsub.f32 1.0, %v75_v26  ;;  %v800_v26 = vld [vmem:[%s1767_s9 + $0x10] sm:$0xff] }
 0x167   :  { %v1596_v43 = vperm.slane %v77_v17, 0 }
 0x168   :  { %565 = vmatmul.f32.gmra.mxu0 %v366_v13 }
 0x169   :  { %v364_v8 = vpop.f32.mrf.mxu0  ;;  %v475_v39 = vpop.f32.mrf.mxu2  ;;  %v607_v51 = vmul.f32 0.0, %v1596_v43 }
 0x16a   :  { %v365_v5 = vadd.f32 %v1196_v36, %v364_v8 }
 0x16b   :  { %v511_v42 = vpop.f32.mrf.mxu3 }
 0x16c   :  { %v434_v19 = vadd.f32 %v433_v37, %v365_v5  ;;  %v1641_v37 = vperm.slane %v82_v61, 0 }
 0x16e   :  { %v476_v40 = vadd.f32 %v475_v39, %v434_v19  ;;  %v825_v19 = vand.u32 4294901760, %v801_v9 }
 0x170   :  { %v512_v28 = vadd.f32 %v511_v42, %v476_v40  ;;  %v863_v39 = vsub.f32 %v801_v9, %v825_v19  ;;  %v827_v40 = vand.u32 4294901760, %v800_v26  ;;  %943 = vmatpush.msra.mxu1 %v825_v19  ;;  %826 = vmatpush.msrb.mxu2 %v825_v19  ;;  %v799_v42 = vld [vmem:[%s1767_s9 + $0x8] sm:$0xff] }
 0x172   :  { %909 = vmatpush.msra.mxu0 %v863_v39  ;;  %945 = vmatpush.msra.mxu1 %v827_v40 }
 0x173   :  { %828 = vmatpush.msrb.mxu2 %v827_v40 }
 0x1cd   :  { %v437_v24 = vpop.f32.mrf.mxu1 }
 0x1d5   :  { %v372_v25 = vpop.f32.mrf.mxu0  ;;  %v595_v48 = vpop.f32.mrf.mxu1 }
 0x1d6   :  { %v373_v38 = vadd.f32 %v1196_v36, %v372_v25  ;;  %v480_v9 = vpop.f32.mrf.mxu2 }
 0x1d8   :  { %v1594_v41 = vadd.f32 %v437_v24, %v373_v38 }
 0x1dd   :  { %v562_v44 = vpop.f32.mrf.mxu0 }
 0x1de   :  { %v563_v47 = vadd.f32 %v562_v44, %v512_v28  ;;  %v864_v44 = vand.u32 4294901760, %v863_v39 }
 0x1e0   :  { %v596_v50 = vadd.f32 %v595_v48, %v563_v47  ;;  %v869_v47 = vsub.f32 %v800_v26, %v827_v40  ;;  %v829_v48 = vand.u32 4294901760, %v799_v42 }
 0x1e2   :  { %v1602_v52 = vadd.f32 %v602_v49, %v596_v50  ;;  %v798_v50 = vld [vmem:[%s1767_s9] sm:$0xff]  ;;  %v875_v56 = vsub.f32 %v799_v42, %v829_v48  ;;  %912 = vmatpush.msra.mxu0 %v869_v47  ;;  %947 = vmatpush.msra.mxu1 %v829_v48 }
 0x1e3   :  { %830 = vmatpush.msrb.mxu2 %v829_v48 }
 0x1e4   :  { %v608_v55 = vadd.f32 %v607_v51, %v1602_v52  ;;  %v639_v20 = vrot.slane %v1602_v52, 2  ;;  %v665_v17 = vrot.slane %v1602_v52, 4  ;;  %915 = vmatpush.msra.mxu0 %v875_v56 }
 0x1e6   :  { %vm610_vm12 = vcmp.ge.f32.partialorder %v608_v55, %v1197_v53 }
 0x1e7   :  { %v1160_v57 = vsel %vm610_vm12, 1.0, %v1232_v32  ;;  %vm618_vm15 = vmand %vm610_vm12, %vm1622_vm14  ;;  %v614_v10 = vsel %vm610_vm12, %v1629_v1, %v608_v55  ;;  %v870_v55 = vand.u32 4294901760, %v869_v47 }
 0x1e8   :  { %v623_v58 = vsel %vm622_vm11, %v1160_v57, 0.0  ;;  %636 = vst.msk [vmem:[#allocation3] sm:$0x3] %vm622_vm11, %v1160_v57  ;;  %v621_v12 = vsel %vm618_vm15, %v620_v6, %v1197_v53  ;;  %v637_v16 = vmul.f32 %v614_v10, %v1596_v43  ;;  %v865_v53 = vsub.f32 %v863_v39, %v864_v44  ;;  %v566_v39 = vpop.f32.mrf.mxu0 }
 0x1e9   :  { %v624_v59 = vrot.slane %v623_v58, 4  ;;  %v831_v57 = vand.u32 4294901760, %v798_v50 }
 0x1ea   :  { %v641_v27 = vadd.f32 %v639_v20, %v637_v16 }
 0x1eb   :  { %v625_v0 = vadd.f32 %v624_v59, %v623_v58  ;;  %v866_v58 = vand.u32 4294901760, %v865_v53  ;;  %v871_v59 = vsub.f32 %v869_v47, %v870_v55  ;;  %v881_v60 = vsub.f32 %v798_v50, %v831_v57  ;;  %949 = vmatpush.msra.mxu1 %v831_v57  ;;  %832 = vmatpush.msrb.mxu2 %v831_v57  ;;  %v599_v50 = vpop.f32.mrf.mxu1 }
 0x1ed   :  { %v626_v46 = vrot.slane %v625_v0, 2  ;;  %867 = vmatpush.msrb.mxu3 %v866_v58  ;;  %978 = vmatpush.msra.mxu2 %v864_v44  ;;  %v882_v63 = vand.u32 4294901760, %v881_v60 }
 0x1ee   :  { %918 = vmatpush.msra.mxu0 %v881_v60 }
 0x1ef   :  { %v627_v45 = vadd.f32 %v626_v46, %v625_v0  ;;  %v876_v0 = vand.u32 4294901760, %v875_v56  ;;  %v872_v46 = vand.u32 4294901760, %v871_v59  ;;  %982 = vmatpush.msra.mxu2 %v870_v55  ;;  %v883_v6 = vsub.f32 %v881_v60, %v882_v63 }
 0x1f1   :  { %v628_v2 = vrot.slane %v627_v45, 1  ;;  %873 = vmatpush.msrb.mxu3 %v872_v46  ;;  %986 = vmatpush.msra.mxu2 %v876_v0  ;;  %v884_v10 = vand.u32 4294901760, %v883_v6 }
 0x1f3   :  { %v629_v4 = vadd.f32 %v628_v2, %v627_v45  ;;  %v877_v45 = vsub.f32 %v875_v56, %v876_v0  ;;  %990 = vmatpush.msra.mxu2 %v882_v63 }
 0x1f5   :  { %v631_v7 = vmul.f32 5e-06, %v629_v4 }
 0x1f7   :  { %v1161_v11 = vadd.f32 -0.0001, %v631_v7 }
 0x1f9   :  { %v633_v23 = vadd.f32 %v1161_v11, %v621_v12 }
 0x1fb   :  { %v634_v13 = vmax.f32 %v633_v23, 0.5 }
 0x1fd   :  { %v635_v22 = vmin.f32 %v634_v13, 2.0 }
 0x1ff   :  { %vm642_vm0 = vcmp.ge.f32.partialorder %v641_v27, %v635_v22  ;;  %v648_v14 = vadd.f32 %v1641_v37, %v635_v22 }
 0x200   :  { %v1162_v29 = vsel %vm642_vm0, 1.0, %v1232_v32  ;;  %v645_v15 = vsel %vm642_vm0, %v1629_v1, %v641_v27  ;;  %vm646_vm1 = vmand %vm642_vm0, %vm1622_vm14 }
 0x201   :  { %v650_v30 = vsel %vm622_vm11, %v1162_v29, 0.0  ;;  %663 = vst.msk [vmem:[#allocation3 + $0x2] sm:$0x3] %vm622_vm11, %v1162_v29  ;;  %v649_v24 = vsel %vm646_vm1, %v648_v14, %v635_v22  ;;  %v664_v25 = vmul.f32 %v645_v15, %v1596_v43 }
 0x202   :  { %v651_v31 = vrot.slane %v650_v30, 4 }
 0x203   :  { %v667_v49 = vadd.f32 %v665_v17, %v664_v25 }
 0x204   :  { %v652_v33 = vadd.f32 %v651_v31, %v650_v30 }
 0x206   :  { %v653_v34 = vrot.slane %v652_v33, 2 }
 0x208   :  { %v654_v35 = vadd.f32 %v653_v34, %v652_v33  ;;  %v690_v34 = vrot.slane %v1602_v52, 6 }
 0x20a   :  { %v655_v36 = vrot.slane %v654_v35, 1 }
 0x20c   :  { %v656_v8 = vadd.f32 %v655_v36, %v654_v35 }
 0x20e   :  { %v1643_v54 = vadd.f32 %v656_v8, %v629_v4  ;;  %v878_v4 = vand.u32 4294901760, %v877_v45 }
 0x210   :  { %v658_v5 = vmul.f32 5e-06, %v1643_v54  ;;  %879 = vmatpush.msrb.mxu3 %v878_v4 }
 0x212   :  { %v1163_v18 = vadd.f32 -0.0001, %v658_v5  ;;  %885 = vmatpush.msrb.mxu3 %v884_v10 }
 0x214   :  { %v660_v38 = vadd.f32 %v1163_v18, %v649_v24  ;;  %1013 = vmatpush.msra.mxu3 %v825_v19  ;;  %v481_v18 = vadd.f32 %v480_v9, %v1594_v41 }
 0x216   :  { %v661_v28 = vmax.f32 %v660_v38, 0.5  ;;  %1015 = vmatpush.msra.mxu3 %v827_v40  ;;  %v517_v38 = vpop.f32.mrf.mxu3 }
 0x217   :  { %v518_v40 = vadd.f32 %v517_v38, %v481_v18 }
 0x218   :  { %v662_v51 = vmin.f32 %v661_v28, 2.0  ;;  %1017 = vmatpush.msra.mxu3 %v829_v48 }
 0x219   :  { %v567_v28 = vadd.f32 %v566_v39, %v518_v40 }
 0x21a   :  { %vm668_vm2 = vcmp.ge.f32.partialorder %v667_v49, %v662_v51  ;;  %v673_v13 = vadd.f32 %v662_v51, %v1641_v37  ;;  %1019 = vmatpush.msra.mxu3 %v831_v57  ;;  %v603_v57 = vld [vmem:[%s1760_s2 + $0x8] sm:$0xff] }
 0x21b   :  { %v1164_v21 = vsel %vm668_vm2, 1.0, %v1232_v32  ;;  %vm672_vm3 = vmand %vm668_vm2, %vm1622_vm14  ;;  %v671_v22 = vsel %vm668_vm2, %v1629_v1, %v667_v49  ;;  %v600_v53 = vadd.f32 %v599_v50, %v567_v28 }
 0x21c   :  { %v675_v61 = vsel %vm622_vm11, %v1164_v21, 0.0  ;;  %688 = vst.msk [vmem:[#allocation3 + $0x4] sm:$0x3] %vm622_vm11, %v1164_v21  ;;  %v674_v29 = vsel %vm672_vm3, %v673_v13, %v662_v51  ;;  %v689_v31 = vmul.f32 %v671_v22, %v1596_v43 }
 0x21d   :  { %v676_v62 = vrot.slane %v675_v61, 4  ;;  %v1697_v0 = vadd.f32 %v603_v57, %v600_v53 }
 0x21e   :  { %v692_v36 = vadd.f32 %v690_v34, %v689_v31 }
 0x21f   :  { %v677_v2 = vadd.f32 %v676_v62, %v675_v61 }
 0x221   :  { %v678_v7 = vrot.slane %v677_v2, 2 }
 0x223   :  { %v679_v11 = vadd.f32 %v678_v7, %v677_v2 }
 0x225   :  { %v680_v12 = vrot.slane %v679_v11, 1 }
 0x227   :  { %v681_v23 = vadd.f32 %v680_v12, %v679_v11 }
 0x229   :  { %v682_v16 = vadd.f32 %v681_v23, %v1643_v54 }
 0x22b   :  { %v683_v20 = vmul.f32 5e-06, %v682_v16 }
 0x22d   :  { %v1165_v27 = vadd.f32 -0.0001, %v683_v20 }
 0x22f   :  { %v685_v30 = vadd.f32 %v1165_v27, %v674_v29 }
 0x231   :  { %v686_v33 = vmax.f32 %v685_v30, 0.5  ;;  %v739_v30 = vrot.slane %v1697_v0, 2 }
 0x233   :  { %v687_v35 = vmin.f32 %v686_v33, 2.0 }
 0x235   :  { %vm693_vm5 = vcmp.ge.f32.partialorder %v692_v36, %v687_v35  ;;  %v698_v41 = vadd.f32 %v687_v35, %v1641_v37 }
 0x236   :  { %v1166_v8 = vsel %vm693_vm5, 1.0, %v1232_v32  ;;  %vm697_vm7 = vmand %vm693_vm5, %vm1622_vm14  ;;  %v696_v51 = vsel %vm693_vm5, %v1629_v1, %v692_v36 }
 0x237   :  { %v700_v54 = vsel %vm622_vm11, %v1166_v8, 0.0  ;;  %713 = vst.msk [vmem:[#allocation3 + $0x6] sm:$0x3] %vm622_vm11, %v1166_v8  ;;  %v699_v58 = vsel %vm697_vm7, %v698_v41, %v687_v35  ;;  %v714_v21 = vmul.f32 %v696_v51, %v1596_v43  ;;  %vm1127_vm7 = vcmask 9216  }
 0x238   :  { %v701_v14 = vrot.slane %v700_v54, 4 }
 0x239   :  { %v715_v46 = vadd.f32 %v714_v21, %v1697_v0 }
 0x23a   :  { %v702_v15 = vadd.f32 %v701_v14, %v700_v54 }
 0x23c   :  { %v703_v5 = vrot.slane %v702_v15, 2 }
 0x23e   :  { %v704_v19 = vadd.f32 %v703_v5, %v702_v15  ;;  %v796_v24 = vld [vmem:[#allocation3] sm:$0xff] }
 0x23f   :  { %v808_v52 = vsel %vm806_vm6, %v796_v24, 0 }
 0x240   :  { %v705_v25 = vrot.slane %v704_v19, 1  ;;  %v1683_v26 = vand.u32 4294901760, %v808_v52 }
 0x242   :  { %v706_v17 = vadd.f32 %v705_v25, %v704_v19  ;;  %887 = vmatmul.f32.vlgmr.msrb.gmra.mxu3 %v1683_v26  ;;  %v834_v42 = vsub.f32 %v808_v52, %v1683_v26 }
 0x244   :  { %v707_v44 = vadd.f32 %v706_v17, %v682_v16  ;;  %921 = vmatmul.f32.vlgmr.msra.gmra.mxu0 %v834_v42  ;;  %v835_v47 = vand.u32 4294901760, %v834_v42  ;;  %v764_v17 = vrot.slane %v1697_v0, 4 }
 0x246   :  { %v708_v48 = vmul.f32 5e-06, %v707_v44  ;;  %953 = vmatmul.f32.vlgmr.msra.gmra.mxu1 %v835_v47  ;;  %v836_v49 = vsub.f32 %v834_v42, %v835_v47 }
 0x248   :  { %v1167_v55 = vadd.f32 -0.0001, %v708_v48  ;;  %v837_v56 = vand.u32 4294901760, %v836_v49 }
 0x24a   :  { %v710_v59 = vadd.f32 %v1167_v55, %v699_v58  ;;  %838 = vmatmul.f32.vlgmr.msrb.gmra.mxu2 %v837_v56 }
 0x24c   :  { %v711_v60 = vmax.f32 %v710_v59, 0.5 }
 0x24e   :  { %v712_v61 = vmin.f32 %v711_v60, 2.0 }
 0x250   :  { %vm716_vm4 = vcmp.ge.f32.partialorder %v715_v46, %v712_v61  ;;  %v721_v12 = vadd.f32 %v712_v61, %v1641_v37 }
 0x251   :  { %v1168_v62 = vsel %vm716_vm4, 1.0, %v1232_v32  ;;  %vm720_vm8 = vmand %vm716_vm4, %vm1622_vm14  ;;  %v719_v16 = vsel %vm716_vm4, %v1629_v1, %v715_v46 }
 0x252   :  { %v723_v45 = vsel %vm622_vm11, %v1168_v62, 0.0  ;;  %736 = vst.msk [vmem:[#allocation3 + $0x8] sm:$0x3] %vm622_vm11, %v1168_v62  ;;  %v722_v20 = vsel %vm720_vm8, %v721_v12, %v712_v61  ;;  %v737_v27 = vmul.f32 %v719_v16, %v1596_v43  ;;  %v789_v62 = vrot.slane %v1697_v0, 6  ;;  %v1199_v0 = vld [vmem:[%s1768_s10] ss:$0 sm:$0xff] }
 0x253   :  { %v724_v63 = vrot.slane %v723_v45, 4  ;;  %s1233_s10 = smov [#allocation4]  }
 0x254   :  { %v741_v33 = vadd.f32 %v739_v30, %v737_v27  ;;  %s1134_s12 = sshll.u32 %s1233_s10, 4  ;;  %s1135_s12 = int_to_ptr.vmem [resolvable:$true] %s1134_s12 }
 0x255   :  { %v725_v2 = vadd.f32 %v724_v63, %v723_v45 }
 0x257   :  { %v726_v4 = vrot.slane %v725_v2, 2 }
 0x259   :  { %v727_v6 = vadd.f32 %v726_v4, %v725_v2 }
 0x25b   :  { %v728_v7 = vrot.slane %v727_v6, 1 }
 0x25d   :  { %v729_v10 = vadd.f32 %v728_v7, %v727_v6 }
 0x25f   :  { %v730_v11 = vadd.f32 %v729_v10, %v707_v44 }
 0x261   :  { %v731_v23 = vmul.f32 5e-06, %v730_v11 }
 0x263   :  { %v1169_v13 = vadd.f32 -0.0001, %v731_v23 }
 0x265   :  { %v733_v22 = vadd.f32 %v1169_v13, %v722_v20 }
 0x267   :  { %v734_v29 = vmax.f32 %v733_v22, 0.5 }
 0x269   :  { %v735_v31 = vmin.f32 %v734_v29, 2.0 }
 0x26b   :  { %vm742_vm9 = vcmp.ge.f32.partialorder %v741_v33, %v735_v31  ;;  %v747_v18 = vadd.f32 %v735_v31, %v1641_v37 }
 0x26c   :  { %v1170_v34 = vsel %vm742_vm9, 1.0, %v1232_v32  ;;  %vm746_vm10 = vmand %vm742_vm9, %vm1622_vm14  ;;  %v745_v24 = vsel %vm742_vm9, %v1629_v1, %v741_v33 }
 0x26d   :  { %v749_v35 = vsel %vm622_vm11, %v1170_v34, 0.0  ;;  %762 = vst.msk [vmem:[#allocation3 + $0xa] sm:$0x3] %vm622_vm11, %v1170_v34  ;;  %v748_v25 = vsel %vm746_vm10, %v747_v18, %v735_v31  ;;  %v763_v39 = vmul.f32 %v745_v24, %v1596_v43 }
 0x26e   :  { %v750_v36 = vrot.slane %v749_v35, 4 }
 0x26f   :  { %v766_v28 = vadd.f32 %v764_v17, %v763_v39 }
 0x270   :  { %v751_v8 = vadd.f32 %v750_v36, %v749_v35 }
 0x272   :  { %v752_v54 = vrot.slane %v751_v8, 2 }
 0x274   :  { %v753_v14 = vadd.f32 %v752_v54, %v751_v8 }
 0x276   :  { %v754_v15 = vrot.slane %v753_v14, 1 }
 0x278   :  { %v755_v5 = vadd.f32 %v754_v15, %v753_v14 }
 0x27a   :  { %v756_v9 = vadd.f32 %v755_v5, %v730_v11 }
 0x27c   :  { %v757_v19 = vmul.f32 5e-06, %v756_v9 }
 0x27e   :  { %v1171_v52 = vadd.f32 -0.0001, %v757_v19 }
 0x280   :  { %v759_v38 = vadd.f32 %v1171_v52, %v748_v25 }
 0x282   :  { %v760_v40 = vmax.f32 %v759_v38, 0.5 }
 0x284   :  { %v761_v42 = vmin.f32 %v760_v40, 2.0 }
 0x286   :  { %vm767_vm12 = vcmp.ge.f32.partialorder %v766_v28, %v761_v42  ;;  %v772_v56 = vadd.f32 %v761_v42, %v1641_v37 }
 0x287   :  { %v1172_v44 = vsel %vm767_vm12, 1.0, %v1232_v32  ;;  %vm771_vm13 = vmand %vm767_vm12, %vm1622_vm14  ;;  %v770_v58 = vsel %vm767_vm12, %v1629_v1, %v766_v28 }
 0x288   :  { %v774_v47 = vsel %vm622_vm11, %v1172_v44, 0.0  ;;  %787 = vst.msk [vmem:[#allocation3 + $0xc] sm:$0x3] %vm622_vm11, %v1172_v44  ;;  %v773_v21 = vsel %vm771_vm13, %v772_v56, %v761_v42  ;;  %v788_v61 = vmul.f32 %v770_v58, %v1596_v43 }
 0x289   :  { %v775_v41 = vrot.slane %v774_v47, 4 }
 0x28a   :  { %v791_v63 = vadd.f32 %v789_v62, %v788_v61 }
 0x28b   :  { %v776_v48 = vadd.f32 %v775_v41, %v774_v47 }
 0x28d   :  { %v777_v49 = vrot.slane %v776_v48, 2 }
 0x28f   :  { %v778_v50 = vadd.f32 %v777_v49, %v776_v48 }
 0x291   :  { %v779_v51 = vrot.slane %v778_v50, 1 }
 0x293   :  { %v780_v53 = vadd.f32 %v779_v51, %v778_v50 }
 0x295   :  { %v781_v55 = vadd.f32 %v780_v53, %v756_v9 }
 0x297   :  { %v782_v57 = vmul.f32 5e-06, %v781_v55 }
 0x299   :  { %v1173_v59 = vadd.f32 -0.0001, %v782_v57 }
 0x29b   :  { %v784_v60 = vadd.f32 %v1173_v59, %v773_v21 }
 0x29d   :  { %v785_v46 = vmax.f32 %v784_v60, 0.5 }
 0x29f   :  { %v786_v45 = vmin.f32 %v785_v46, 2.0 }
 0x2a1   :  { %vm792_vm15 = vcmp.ge.f32.partialorder %v791_v63, %v786_v45 }
 0x2a2   :  { %v1174_v2 = vsel %vm792_vm15, 1.0, %v1232_v32 }
 0x2a3   :  { %795 = vst.msk [vmem:[#allocation3 + $0xe] sm:$0x3] %vm622_vm11, %v1174_v2 }
 0x2aa   :  { %v797_v3 = vld [vmem:[#allocation3 + $0x8] sm:$0xff] }
 0x2ab   :  { %v811_v37 = vsel %vm806_vm6, %v797_v3, 0 }
 0x2ac   :  { %v841_v4 = vand.u32 4294901760, %v811_v37 }
 0x2ae   :  { %891 = vmatmul.f32.gmra.mxu3 %v841_v4  ;;  %v842_v1 = vsub.f32 %v811_v37, %v841_v4 }
 0x2b0   :  { %926 = vmatmul.f32.gmra.mxu0 %v842_v1  ;;  %v843_v6 = vand.u32 4294901760, %v842_v1 }
 0x2b2   :  { %959 = vmatmul.f32.gmra.mxu1 %v843_v6  ;;  %v844_v43 = vsub.f32 %v842_v1, %v843_v6 }
 0x2b4   :  { %v845_v7 = vand.u32 4294901760, %v844_v43 }
 0x2b6   :  { %846 = vmatmul.f32.gmra.mxu2 %v845_v7  ;;  %1021 = vmatmul.f32.vlgmr.msra.gmra.mxu3 %v1683_v26 }
 0x2be   :  { %992 = vmatmul.f32.vlgmr.msra.gmra.mxu2 %v1683_v26  ;;  %1025 = vmatmul.f32.gmra.mxu3 %v841_v4 }
 0x2c1   :  { %v922_v20 = vpop.f32.mrf.mxu0 }
 0x2c3   :  { %v954_v27 = vpop.f32.mrf.mxu1 }
 0x2c5   :  { %v888_v10 = vpop.f32.mrf.mxu3 }
 0x2c6   :  { %996 = vmatmul.f32.gmra.mxu2 %v841_v4 }
 0x2cd   :  { %v839_v11 = vpop.f32.mrf.mxu2 }
 0x2ce   :  { %v840_v12 = vadd.f32 %v1199_v0, %v839_v11 }
 0x2d0   :  { %v889_v23 = vadd.f32 %v888_v10, %v840_v12 }
 0x2d2   :  { %v923_v22 = vadd.f32 %v922_v20, %v889_v23 }
 0x2d4   :  { %v955_v29 = vadd.f32 %v954_v27, %v923_v22 }
 0x32d   :  { %v927_v39 = vpop.f32.mrf.mxu0 }
 0x32f   :  { %v960_v44 = vpop.f32.mrf.mxu1 }
 0x331   :  { %v892_v16 = vpop.f32.mrf.mxu3 }
 0x339   :  { %v847_v13 = vpop.f32.mrf.mxu2  ;;  %v1022_v33 = vpop.f32.mrf.mxu3 }
 0x33a   :  { %v848_v19 = vadd.f32 %v1199_v0, %v847_v13 }
 0x33c   :  { %v893_v25 = vadd.f32 %v892_v16, %v848_v19 }
 0x33e   :  { %v928_v42 = vadd.f32 %v927_v39, %v893_v25 }
 0x340   :  { %v961_v48 = vadd.f32 %v960_v44, %v928_v42 }
 0x341   :  { %v993_v30 = vpop.f32.mrf.mxu2  ;;  %v1026_v53 = vpop.f32.mrf.mxu3 }
 0x342   :  { %v994_v31 = vadd.f32 %v993_v30, %v955_v29 }
 0x344   :  { %v1023_v26 = vadd.f32 %v1022_v33, %v994_v31 }
 0x346   :  { %v1029_v34 = vmul.f32 0.1, %v1023_v26 }
 0x348   :  { %vm1031_vm11 = vcmp.ge.f32.partialorder %v1029_v34, 1.0 }
 0x349   :  { %v1035_v35 = vsel %vm1031_vm11, 0.0, %v1029_v34  ;;  %v997_v47 = vpop.f32.mrf.mxu2  ;;  %v1175_v43 = vsel %vm1031_vm11, 1.0, %v1232_v32 }
 0x34a   :  { %v1037_v36 = vrot.slane %v1035_v35, 6  ;;  %v998_v50 = vadd.f32 %v997_v47, %v961_v48 }
 0x34c   :  { %v1039_v8 = vsub.f32 %v1023_v26, %v1037_v36  ;;  %v1027_v55 = vadd.f32 %v1026_v53, %v998_v50 }
 0x34e   :  { %v1040_v54 = vmul.f32 0.1, %v1039_v8 }
 0x350   :  { %v1042_v14 = vrot.slane %v1040_v54, 2 }
 0x352   :  { %v1044_v15 = vadd.f32 %v1042_v14, %v1035_v35 }
 0x354   :  { %vm1045_vm14 = vcmp.ge.f32.partialorder %v1044_v15, 1.0 }
 0x355   :  { %v1049_v5 = vsel %vm1045_vm14, 0.0, %v1044_v15  ;;  %v1176_v6 = vsel %vm1045_vm14, 1.0, %v1232_v32 }
 0x356   :  { %v1051_v9 = vrot.slane %v1049_v5, 4  ;;  %v1048_v10 = vadd.f32 %v1176_v6, %v1175_v43 }
 0x358   :  { %v1053_v18 = vsub.f32 %v1023_v26, %v1051_v9 }
 0x35a   :  { %v1054_v24 = vmul.f32 0.1, %v1053_v18 }
 0x35c   :  { %v1056_v52 = vrot.slane %v1054_v24, 4 }
 0x35e   :  { %v1058_v38 = vadd.f32 %v1056_v52, %v1049_v5 }
 0x360   :  { %vm1059_vm0 = vcmp.ge.f32.partialorder %v1058_v38, 1.0 }
 0x361   :  { %v1063_v40 = vsel %vm1059_vm0, 0.0, %v1058_v38  ;;  %v1177_v7 = vsel %vm1059_vm0, 1.0, %v1232_v32 }
 0x362   :  { %v1065_v17 = vrot.slane %v1063_v40, 2  ;;  %v1062_v23 = vadd.f32 %v1177_v7, %v1048_v10 }
 0x364   :  { %v1067_v28 = vsub.f32 %v1023_v26, %v1065_v17 }
 0x366   :  { %v1068_v41 = vmul.f32 0.1, %v1067_v28 }
 0x368   :  { %v1070_v49 = vrot.slane %v1068_v41, 6 }
 0x36a   :  { %v1072_v51 = vadd.f32 %v1070_v49, %v1063_v40 }
 0x36c   :  { %vm1073_vm1 = vcmp.ge.f32.partialorder %v1072_v51, 1.0 }
 0x36d   :  { %v1077_v56 = vsel %vm1073_vm1, 0.0, %v1072_v51  ;;  %v1178_v12 = vsel %vm1073_vm1, 1.0, %v1232_v32 }
 0x36e   :  { %v1078_v57 = vsub.f32 %v1027_v55, %v1077_v56  ;;  %v1076_v20 = vadd.f32 %v1178_v12, %v1062_v23 }
 0x370   :  { %v1079_v58 = vmul.f32 0.1, %v1078_v57 }
 0x372   :  { %v1080_v59 = vadd.f32 %v1079_v58, %v1077_v56 }
 0x374   :  { %vm1081_vm2 = vcmp.ge.f32.partialorder %v1080_v59, 1.0 }
 0x375   :  { %v1085_v21 = vsel %vm1081_vm2, 0.0, %v1080_v59  ;;  %v1179_v13 = vsel %vm1081_vm2, 1.0, %v1232_v32 }
 0x376   :  { %v1087_v60 = vrot.slane %v1085_v21, 6  ;;  %v1084_v29 = vadd.f32 %v1179_v13, %v1076_v20 }
 0x378   :  { %v1089_v61 = vsub.f32 %v1027_v55, %v1087_v60 }
 0x37a   :  { %v1090_v46 = vmul.f32 0.1, %v1089_v61 }
 0x37c   :  { %v1092_v62 = vrot.slane %v1090_v46, 2 }
 0x37e   :  { %v1094_v45 = vadd.f32 %v1092_v62, %v1085_v21 }
 0x380   :  { %vm1095_vm3 = vcmp.ge.f32.partialorder %v1094_v45, 1.0 }
 0x381   :  { %v1099_v63 = vsel %vm1095_vm3, 0.0, %v1094_v45  ;;  %v1180_v27 = vsel %vm1095_vm3, 1.0, %v1232_v32 }
 0x382   :  { %v1101_v2 = vrot.slane %v1099_v63, 4  ;;  %v1098_v33 = vadd.f32 %v1180_v27, %v1084_v29 }
 0x384   :  { %v1103_v3 = vsub.f32 %v1027_v55, %v1101_v2 }
 0x386   :  { %v1104_v37 = vmul.f32 0.1, %v1103_v3 }
 0x388   :  { %v1106_v4 = vrot.slane %v1104_v37, 4 }
 0x38a   :  { %v1108_v1 = vadd.f32 %v1106_v4, %v1099_v63 }
 0x38c   :  { %vm1109_vm5 = vcmp.ge.f32.partialorder %v1108_v1, 1.0 }
 0x38d   :  { %v1113_v0 = vsel %vm1109_vm5, 0.0, %v1108_v1  ;;  %v1181_v31 = vsel %vm1109_vm5, 1.0, %v1232_v32 }
 0x38e   :  { %v1115_v11 = vrot.slane %v1113_v0, 2  ;;  %v1112_v34 = vadd.f32 %v1181_v31, %v1098_v33 }
 0x390   :  { %v1117_v16 = vsub.f32 %v1027_v55, %v1115_v11 }
 0x392   :  { %v1118_v22 = vmul.f32 0.1, %v1117_v16 }
 0x394   :  { %v1120_v30 = vrot.slane %v1118_v22, 6 }
 0x396   :  { %v1122_v26 = vadd.f32 %v1120_v30, %v1113_v0 }
 0x398   :  { %vm1123_vm6 = vcmp.ge.f32.partialorder %v1122_v26, 1.0 }
 0x399   :  { %v1182_v35 = vsel %vm1123_vm6, 1.0, %v1232_v32 }
 0x39a   :  { %v1126_v36 = vadd.f32 %v1182_v35, %v1112_v34 }
 0x39c   :  { %1128 = vst.msk [vmem:[#allocation4] sm:$0x3] %vm1127_vm7, %v1126_v36 }
 0x39d   :  { %1139 = dma.vmem_to_hbm [thread:$0]  %s1135_s12, 32, %s1137_s14, [#allocation5]  }
 0x39e   :  { %1228 = dma.done.wait [#allocation5], 32  }
 0x39f   :  { %1229 = vsyncadd [#allocation5], 4294967264 }
 0x3a0   :  { %1144 = vsyncpa [#allocation5], 1 }

</bundles_post_ra>
